<compile_context>
chip_gen: v7x
topology: tpu7x:2x2x1
jax: 0.10.0
libtpu: 0.0.40
codegen_flags: <defaults>
</compile_context>

<pallas_src>
import math

import jax
import jax.numpy as jnp
from jax.experimental import pallas as pl
from jax.experimental.pallas import tpu as pltpu

EPS = 1e-5


# ---------------------------------------------------------------------------
# Fused kernel: relu(x*scale + shift) -> 2x2 avg-pool (separable) -> 1x1 conv
# ---------------------------------------------------------------------------
def _transition_kernel(x_ref, w1_ref, pw_ref, scale_ref, shift_ref, o_ref, pooled_ref):
    # x_ref:      (Nb, C, HP, 2*W)   lane axis = [input row 2i | input row 2i+1]
    # w1_ref:     (Cout, C)          1x1 conv weight
    # pw_ref:     (W, WP)            separable horizontal-pool matrix (entries 0.25)
    # scale_ref:  (C, 1)             BN (batch stats) folded to an affine map
    # shift_ref:  (C, 1)
    # o_ref:      (Nb, Cout, HP*WP)  pooled conv output, lane-major spatial
    # pooled_ref: (C, HP*WP)         VMEM scratch, reused per image
    nb, _, hp, w2 = x_ref.shape
    w = w2 // 2
    wp = pw_ref.shape[1]

    s = scale_ref[...]                      # (C, 1)   hoisted: VMEM-resident constants
    b = shift_ref[...]                      # (C, 1)
    pw = pw_ref[...]                        # (W, WP)
    w1 = w1_ref[...]                        # (Cout, C)

    # nb and hp are small, VMEM-budgeted Python constants -> static unroll is cheap.
    # TODO(synk): switch to lax.fori_loop(..., unroll=True) if nb*hp grows large.
    for n in range(nb):
        for i in range(hp):
            row = x_ref[n, :, i, :]                            # (C, 2W): rows 2i | 2i+1
            a = jnp.maximum(row * s + b, 0.0)                  # BN affine + ReLU (VPU)
            vsum = a[:, :w] + a[:, w:]                         # vertical 2->1 sum (VPU)
            pooled_ref[:, i * wp:(i + 1) * wp] = jnp.dot(      # horizontal 2->1 (+0.25)
                vsum, pw, preferred_element_type=jnp.float32)  # tiny (W,WP) MXU matmul
        # 1x1 conv over channels: one lane-dense (Cout, HP*WP) tile per image.
        o_ref[n] = jnp.dot(w1, pooled_ref[...], preferred_element_type=jnp.float32)


def transition_pallas(x5, w1, pw, scale, shift, n_block):
    N, C, HP, W2 = x5.shape
    Cout = w1.shape[0]
    WP = pw.shape[1]
    HPWP = HP * WP
    return pl.pallas_call(
        _transition_kernel,
        out_shape=jax.ShapeDtypeStruct((N, Cout, HPWP), jnp.float32),
        grid_spec=pltpu.PrefetchScalarGridSpec(
            num_scalar_prefetch=0,
            grid=(N // n_block,),
            in_specs=[
                pl.BlockSpec((n_block, C, HP, W2), lambda g: (g, 0, 0, 0)),  # activations
                pl.BlockSpec((Cout, C), lambda g: (0, 0)),                   # resident weight
                pl.BlockSpec((W2 // 2, WP), lambda g: (0, 0)),               # resident pool mat
                pl.BlockSpec((C, 1), lambda g: (0, 0)),                      # resident BN scale
                pl.BlockSpec((C, 1), lambda g: (0, 0)),                      # resident BN shift
            ],
            out_specs=pl.BlockSpec((n_block, Cout, HPWP), lambda g: (g, 0, 0)),
            scratch_shapes=[pltpu.VMEM((C, HPWP), jnp.float32)],
        ),
        compiler_params=pltpu.CompilerParams(
            dimension_semantics=("parallel",),       # batch axis: pipelined / megacore
            vmem_limit_bytes=48 * 1024 * 1024,       # explicit budget, < v7x 64 MiB physical
        ),
    )(x5, w1, pw, scale, shift)


# ---------------------------------------------------------------------------
# Transition forward (public wrapper, NCHW in / NCHW out; reshapes are free)
# ---------------------------------------------------------------------------
def transition_forward(x_nchw, params, *, target_block_bytes=2 * 1024 * 1024):
    N, C, H, W = x_nchw.shape
    HP, WP = H // 2, W // 2
    Cout = params["w1"].shape[0]

    # One-pass BN batch statistics (training-mode BatchNorm, biased variance):
    # E[x] and E[x^2] over the same axes fuse into a single HBM read of x.
    # NOTE: var = E[x^2]-E[x]^2 is fine for unit-scale activations; use Welford/two-pass
    # if |mean| >> std is possible.
    m1 = jnp.mean(x_nchw, axis=(0, 2, 3))
    m2 = jnp.mean(x_nchw * x_nchw, axis=(0, 2, 3))
    var = m2 - m1 * m1
    scale = params["gamma"] * jax.lax.rsqrt(var + EPS)
    shift = params["beta"] - m1 * scale

    # Separable horizontal-pool matrix (W, WP); the full 2x2 average factor 0.25 is folded in.
    pw = ((jnp.arange(W)[:, None] // 2) == jnp.arange(WP)[None, :]).astype(jnp.float32) * 0.25

    # Free, contiguous reshape: lane axis now holds the two input rows of one pooled row.
    x5 = x_nchw.reshape(N, C, HP, 2 * W)

    # Images per grid step: ~target_block_bytes activation blocks, capped so
    # 2x(in block) + 2x(out block) stays well under v7x's 64 MiB VMEM, and divides N.
    per_in = C * H * W * 4
    per_out = Cout * HP * WP * 4
    vmem_budget = 40 * 1024 * 1024
    nb = int(max(1, min(N, target_block_bytes // max(per_in, 1))))
    while nb > 1 and 2 * nb * (per_in + per_out) > vmem_budget:
        nb -= 1
    while N % nb:
        nb -= 1

    out3 = transition_pallas(x5, params["w1"], pw,
                             scale.reshape(C, 1), shift.reshape(C, 1), nb)
    return out3.reshape(N, Cout, HP, WP)      # free reshape of the lane-major output


# ---------------------------------------------------------------------------
# Pure-JAX reference (mirrors the PyTorch forward exactly, NCHW)
# ---------------------------------------------------------------------------
def reference_forward(x, w_oihw, gamma, beta):
    m = x.mean(axis=(0, 2, 3), keepdims=True)
    v = ((x - m) ** 2).mean(axis=(0, 2, 3), keepdims=True)
    h = jnp.maximum(
        (x - m) / jnp.sqrt(v + EPS) * gamma.reshape(1, -1, 1, 1) + beta.reshape(1, -1, 1, 1),
        0.0)
    y = jax.lax.conv_general_dilated(h, w_oihw, (1, 1), "VALID",
                                     dimension_numbers=("NCHW", "OIHW", "NCHW"))
    s = jax.lax.reduce_window(y, 0.0, jax.lax.add, (1, 1, 2, 2), (1, 1, 2, 2), "VALID")
    return s * 0.25


if __name__ == "__main__":
    # Small shapes: batch=2, nChannels=4, spatial=16x16, nOutChannels=8.
    N, nChannels, H, W = 2, 4, 16, 16
    nOutChannels = 8

    key = jax.random.PRNGKey(0)
    kw, kx = jax.random.split(key)

    w_oihw = jax.random.normal(kw, (nOutChannels, nChannels, 1, 1), jnp.float32) \
        * (1.0 / math.sqrt(nChannels))
    gamma = jnp.ones((nChannels,), jnp.float32)   # fresh nn.BatchNorm2d (training mode)
    beta = jnp.zeros((nChannels,), jnp.float32)

    params = {
        "w1": w_oihw[:, :, 0, 0],   # (Cout, Cin)
        "gamma": gamma,
        "beta": beta,
    }

    x = jax.random.normal(kx, (N, nChannels, H, W), jnp.float32)

    out = jax.block_until_ready(transition_forward(x, params))
    ref = reference_forward(x, w_oihw, gamma, beta)

    assert out.shape == (N, nOutChannels, H // 2, W // 2), out.shape
    assert jnp.allclose(out, ref, atol=1e-4, rtol=1e-4), float(jnp.max(jnp.abs(out - ref)))

    print("KERNEL_OK")
</pallas_src>

<mosaic_0001>
module attributes {stable_mosaic.version = 11 : i64} {
  func.func @_transition_kernel(%arg0: i32, %arg1: memref<2x4x8x32xf32, #tpu.memory_space<vmem>>, %arg2: memref<8x4xf32, #tpu.memory_space<vmem>>, %arg3: memref<16x8xf32, #tpu.memory_space<vmem>>, %arg4: memref<4x1xf32, #tpu.memory_space<vmem>>, %arg5: memref<4x1xf32, #tpu.memory_space<vmem>>, %arg6: memref<2x8x64xf32, #tpu.memory_space<vmem>>, %arg7: memref<4x64xf32, #tpu.memory_space<vmem>>) attributes {dimension_semantics = [#tpu.dimension_semantics<parallel>], iteration_bounds = array<i64: 1>, scalar_prefetch = 0 : i64, scratch_operands = 1 : i64, tpu.core_type = #tpu.core_type<tc>, window_params = [{transform_indices = @transform_0, window_bounds = array<i64: 2, 4, 8, 32>}, {pipeline_mode = #tpu.pipeline_mode<synchronous>, transform_indices = @transform_1, window_bounds = array<i64: 8, 4>}, {pipeline_mode = #tpu.pipeline_mode<synchronous>, transform_indices = @transform_2, window_bounds = array<i64: 16, 8>}, {pipeline_mode = #tpu.pipeline_mode<synchronous>, transform_indices = @transform_3, window_bounds = array<i64: 4, 1>}, {pipeline_mode = #tpu.pipeline_mode<synchronous>, transform_indices = @transform_4, window_bounds = array<i64: 4, 1>}, {transform_indices = @transform_5, window_bounds = array<i64: 2, 8, 64>}]} {
    %c0 = arith.constant 0 : index
    %c0_0 = arith.constant 0 : index
    %0 = vector.load %arg4[%c0, %c0_0] : memref<4x1xf32, #tpu.memory_space<vmem>>, vector<4x1xf32>
    %c0_1 = arith.constant 0 : index
    %c0_2 = arith.constant 0 : index
    %1 = vector.load %arg5[%c0_1, %c0_2] : memref<4x1xf32, #tpu.memory_space<vmem>>, vector<4x1xf32>
    %c0_3 = arith.constant 0 : index
    %c0_4 = arith.constant 0 : index
    %2 = vector.load %arg3[%c0_3, %c0_4] : memref<16x8xf32, #tpu.memory_space<vmem>>, vector<16x8xf32>
    %c0_5 = arith.constant 0 : index
    %c0_6 = arith.constant 0 : index
    %3 = vector.load %arg2[%c0_5, %c0_6] : memref<8x4xf32, #tpu.memory_space<vmem>>, vector<8x4xf32>
    %c0_7 = arith.constant 0 : index
    %c0_8 = arith.constant 0 : index
    %c0_9 = arith.constant 0 : index
    %c0_10 = arith.constant 0 : index
    %4 = vector.load %arg1[%c0_7, %c0_8, %c0_9, %c0_10] : memref<2x4x8x32xf32, #tpu.memory_space<vmem>>, vector<1x4x1x32xf32>
    %5 = vector.shape_cast %4 : vector<1x4x1x32xf32> to vector<4x32xf32>
    %6 = vector.broadcast %0 : vector<4x1xf32> to vector<4x32xf32>
    %7 = arith.mulf %5, %6 : vector<4x32xf32>
    %8 = vector.broadcast %1 : vector<4x1xf32> to vector<4x32xf32>
    %9 = arith.addf %7, %8 : vector<4x32xf32>
    %cst = arith.constant 0.000000e+00 : f32
    %10 = vector.broadcast %cst : f32 to vector<4x32xf32>
    %11 = arith.maximumf %9, %10 : vector<4x32xf32>
    %12 = vector.extract_strided_slice %11 {offsets = [0, 0], sizes = [4, 16], strides = [1, 1]} : vector<4x32xf32> to vector<4x16xf32>
    %13 = vector.extract_strided_slice %11 {offsets = [0, 16], sizes = [4, 16], strides = [1, 1]} : vector<4x32xf32> to vector<4x16xf32>
    %14 = arith.addf %12, %13 : vector<4x16xf32>
    %cst_11 = arith.constant dense<0.000000e+00> : vector<4x8xf32>
    %15 = tpu.matmul %14, %2, %cst_11 {dimension_numbers = #tpu.dot_dimension_numbers<[1], [0], [0], [1], [0, 0, 1, 1], [], []>} : vector<4x16xf32>, vector<16x8xf32>, vector<4x8xf32> -> vector<4x8xf32>
    %c0_12 = arith.constant 0 : index
    %c0_13 = arith.constant 0 : index
    %16 = vector.load %arg7[%c0_12, %c0_13] : memref<4x64xf32, #tpu.memory_space<vmem>>, vector<4x8xf32>
    tpu.vector_store %arg7[%c0_12, %c0_13], %15 {strides = array<i32>} : memref<4x64xf32, #tpu.memory_space<vmem>>, vector<4x8xf32>,
    %c0_14 = arith.constant 0 : index
    %c0_15 = arith.constant 0 : index
    %c1 = arith.constant 1 : index
    %c0_16 = arith.constant 0 : index
    %17 = vector.load %arg1[%c0_14, %c0_15, %c1, %c0_16] : memref<2x4x8x32xf32, #tpu.memory_space<vmem>>, vector<1x4x1x32xf32>
    %18 = vector.shape_cast %17 : vector<1x4x1x32xf32> to vector<4x32xf32>
    %19 = vector.broadcast %0 : vector<4x1xf32> to vector<4x32xf32>
    %20 = arith.mulf %18, %19 : vector<4x32xf32>
    %21 = vector.broadcast %1 : vector<4x1xf32> to vector<4x32xf32>
    %22 = arith.addf %20, %21 : vector<4x32xf32>
    %cst_17 = arith.constant 0.000000e+00 : f32
    %23 = vector.broadcast %cst_17 : f32 to vector<4x32xf32>
    %24 = arith.maximumf %22, %23 : vector<4x32xf32>
    %25 = vector.extract_strided_slice %24 {offsets = [0, 0], sizes = [4, 16], strides = [1, 1]} : vector<4x32xf32> to vector<4x16xf32>
    %26 = vector.extract_strided_slice %24 {offsets = [0, 16], sizes = [4, 16], strides = [1, 1]} : vector<4x32xf32> to vector<4x16xf32>
    %27 = arith.addf %25, %26 : vector<4x16xf32>
    %cst_18 = arith.constant dense<0.000000e+00> : vector<4x8xf32>
    %28 = tpu.matmul %27, %2, %cst_18 {dimension_numbers = #tpu.dot_dimension_numbers<[1], [0], [0], [1], [0, 0, 1, 1], [], []>} : vector<4x16xf32>, vector<16x8xf32>, vector<4x8xf32> -> vector<4x8xf32>
    %c0_19 = arith.constant 0 : index
    %c8 = arith.constant 8 : index
    %29 = vector.load %arg7[%c0_19, %c8] : memref<4x64xf32, #tpu.memory_space<vmem>>, vector<4x8xf32>
    tpu.vector_store %arg7[%c0_19, %c8], %28 {strides = array<i32>} : memref<4x64xf32, #tpu.memory_space<vmem>>, vector<4x8xf32>,
    %c0_20 = arith.constant 0 : index
    %c0_21 = arith.constant 0 : index
    %c2 = arith.constant 2 : index
    %c0_22 = arith.constant 0 : index
    %30 = vector.load %arg1[%c0_20, %c0_21, %c2, %c0_22] : memref<2x4x8x32xf32, #tpu.memory_space<vmem>>, vector<1x4x1x32xf32>
    %31 = vector.shape_cast %30 : vector<1x4x1x32xf32> to vector<4x32xf32>
    %32 = vector.broadcast %0 : vector<4x1xf32> to vector<4x32xf32>
    %33 = arith.mulf %31, %32 : vector<4x32xf32>
    %34 = vector.broadcast %1 : vector<4x1xf32> to vector<4x32xf32>
    %35 = arith.addf %33, %34 : vector<4x32xf32>
    %cst_23 = arith.constant 0.000000e+00 : f32
    %36 = vector.broadcast %cst_23 : f32 to vector<4x32xf32>
    %37 = arith.maximumf %35, %36 : vector<4x32xf32>
    %38 = vector.extract_strided_slice %37 {offsets = [0, 0], sizes = [4, 16], strides = [1, 1]} : vector<4x32xf32> to vector<4x16xf32>
    %39 = vector.extract_strided_slice %37 {offsets = [0, 16], sizes = [4, 16], strides = [1, 1]} : vector<4x32xf32> to vector<4x16xf32>
    %40 = arith.addf %38, %39 : vector<4x16xf32>
    %cst_24 = arith.constant dense<0.000000e+00> : vector<4x8xf32>
    %41 = tpu.matmul %40, %2, %cst_24 {dimension_numbers = #tpu.dot_dimension_numbers<[1], [0], [0], [1], [0, 0, 1, 1], [], []>} : vector<4x16xf32>, vector<16x8xf32>, vector<4x8xf32> -> vector<4x8xf32>
    %c0_25 = arith.constant 0 : index
    %c16 = arith.constant 16 : index
    %42 = vector.load %arg7[%c0_25, %c16] : memref<4x64xf32, #tpu.memory_space<vmem>>, vector<4x8xf32>
    tpu.vector_store %arg7[%c0_25, %c16], %41 {strides = array<i32>} : memref<4x64xf32, #tpu.memory_space<vmem>>, vector<4x8xf32>,
    %c0_26 = arith.constant 0 : index
    %c0_27 = arith.constant 0 : index
    %c3 = arith.constant 3 : index
    %c0_28 = arith.constant 0 : index
    %43 = vector.load %arg1[%c0_26, %c0_27, %c3, %c0_28] : memref<2x4x8x32xf32, #tpu.memory_space<vmem>>, vector<1x4x1x32xf32>
    %44 = vector.shape_cast %43 : vector<1x4x1x32xf32> to vector<4x32xf32>
    %45 = vector.broadcast %0 : vector<4x1xf32> to vector<4x32xf32>
    %46 = arith.mulf %44, %45 : vector<4x32xf32>
    %47 = vector.broadcast %1 : vector<4x1xf32> to vector<4x32xf32>
    %48 = arith.addf %46, %47 : vector<4x32xf32>
    %cst_29 = arith.constant 0.000000e+00 : f32
    %49 = vector.broadcast %cst_29 : f32 to vector<4x32xf32>
    %50 = arith.maximumf %48, %49 : vector<4x32xf32>
    %51 = vector.extract_strided_slice %50 {offsets = [0, 0], sizes = [4, 16], strides = [1, 1]} : vector<4x32xf32> to vector<4x16xf32>
    %52 = vector.extract_strided_slice %50 {offsets = [0, 16], sizes = [4, 16], strides = [1, 1]} : vector<4x32xf32> to vector<4x16xf32>
    %53 = arith.addf %51, %52 : vector<4x16xf32>
    %cst_30 = arith.constant dense<0.000000e+00> : vector<4x8xf32>
    %54 = tpu.matmul %53, %2, %cst_30 {dimension_numbers = #tpu.dot_dimension_numbers<[1], [0], [0], [1], [0, 0, 1, 1], [], []>} : vector<4x16xf32>, vector<16x8xf32>, vector<4x8xf32> -> vector<4x8xf32>
    %c0_31 = arith.constant 0 : index
    %c24 = arith.constant 24 : index
    %55 = vector.load %arg7[%c0_31, %c24] : memref<4x64xf32, #tpu.memory_space<vmem>>, vector<4x8xf32>
    tpu.vector_store %arg7[%c0_31, %c24], %54 {strides = array<i32>} : memref<4x64xf32, #tpu.memory_space<vmem>>, vector<4x8xf32>,
    %c0_32 = arith.constant 0 : index
    %c0_33 = arith.constant 0 : index
    %c4 = arith.constant 4 : index
    %c0_34 = arith.constant 0 : index
    %56 = vector.load %arg1[%c0_32, %c0_33, %c4, %c0_34] : memref<2x4x8x32xf32, #tpu.memory_space<vmem>>, vector<1x4x1x32xf32>
    %57 = vector.shape_cast %56 : vector<1x4x1x32xf32> to vector<4x32xf32>
    %58 = vector.broadcast %0 : vector<4x1xf32> to vector<4x32xf32>
    %59 = arith.mulf %57, %58 : vector<4x32xf32>
    %60 = vector.broadcast %1 : vector<4x1xf32> to vector<4x32xf32>
    %61 = arith.addf %59, %60 : vector<4x32xf32>
    %cst_35 = arith.constant 0.000000e+00 : f32
    %62 = vector.broadcast %cst_35 : f32 to vector<4x32xf32>
    %63 = arith.maximumf %61, %62 : vector<4x32xf32>
    %64 = vector.extract_strided_slice %63 {offsets = [0, 0], sizes = [4, 16], strides = [1, 1]} : vector<4x32xf32> to vector<4x16xf32>
    %65 = vector.extract_strided_slice %63 {offsets = [0, 16], sizes = [4, 16], strides = [1, 1]} : vector<4x32xf32> to vector<4x16xf32>
    %66 = arith.addf %64, %65 : vector<4x16xf32>
    %cst_36 = arith.constant dense<0.000000e+00> : vector<4x8xf32>
    %67 = tpu.matmul %66, %2, %cst_36 {dimension_numbers = #tpu.dot_dimension_numbers<[1], [0], [0], [1], [0, 0, 1, 1], [], []>} : vector<4x16xf32>, vector<16x8xf32>, vector<4x8xf32> -> vector<4x8xf32>
    %c0_37 = arith.constant 0 : index
    %c32 = arith.constant 32 : index
    %68 = vector.load %arg7[%c0_37, %c32] : memref<4x64xf32, #tpu.memory_space<vmem>>, vector<4x8xf32>
    tpu.vector_store %arg7[%c0_37, %c32], %67 {strides = array<i32>} : memref<4x64xf32, #tpu.memory_space<vmem>>, vector<4x8xf32>,
    %c0_38 = arith.constant 0 : index
    %c0_39 = arith.constant 0 : index
    %c5 = arith.constant 5 : index
    %c0_40 = arith.constant 0 : index
    %69 = vector.load %arg1[%c0_38, %c0_39, %c5, %c0_40] : memref<2x4x8x32xf32, #tpu.memory_space<vmem>>, vector<1x4x1x32xf32>
    %70 = vector.shape_cast %69 : vector<1x4x1x32xf32> to vector<4x32xf32>
    %71 = vector.broadcast %0 : vector<4x1xf32> to vector<4x32xf32>
    %72 = arith.mulf %70, %71 : vector<4x32xf32>
    %73 = vector.broadcast %1 : vector<4x1xf32> to vector<4x32xf32>
    %74 = arith.addf %72, %73 : vector<4x32xf32>
    %cst_41 = arith.constant 0.000000e+00 : f32
    %75 = vector.broadcast %cst_41 : f32 to vector<4x32xf32>
    %76 = arith.maximumf %74, %75 : vector<4x32xf32>
    %77 = vector.extract_strided_slice %76 {offsets = [0, 0], sizes = [4, 16], strides = [1, 1]} : vector<4x32xf32> to vector<4x16xf32>
    %78 = vector.extract_strided_slice %76 {offsets = [0, 16], sizes = [4, 16], strides = [1, 1]} : vector<4x32xf32> to vector<4x16xf32>
    %79 = arith.addf %77, %78 : vector<4x16xf32>
    %cst_42 = arith.constant dense<0.000000e+00> : vector<4x8xf32>
    %80 = tpu.matmul %79, %2, %cst_42 {dimension_numbers = #tpu.dot_dimension_numbers<[1], [0], [0], [1], [0, 0, 1, 1], [], []>} : vector<4x16xf32>, vector<16x8xf32>, vector<4x8xf32> -> vector<4x8xf32>
    %c0_43 = arith.constant 0 : index
    %c40 = arith.constant 40 : index
    %81 = vector.load %arg7[%c0_43, %c40] : memref<4x64xf32, #tpu.memory_space<vmem>>, vector<4x8xf32>
    tpu.vector_store %arg7[%c0_43, %c40], %80 {strides = array<i32>} : memref<4x64xf32, #tpu.memory_space<vmem>>, vector<4x8xf32>,
    %c0_44 = arith.constant 0 : index
    %c0_45 = arith.constant 0 : index
    %c6 = arith.constant 6 : index
    %c0_46 = arith.constant 0 : index
    %82 = vector.load %arg1[%c0_44, %c0_45, %c6, %c0_46] : memref<2x4x8x32xf32, #tpu.memory_space<vmem>>, vector<1x4x1x32xf32>
    %83 = vector.shape_cast %82 : vector<1x4x1x32xf32> to vector<4x32xf32>
    %84 = vector.broadcast %0 : vector<4x1xf32> to vector<4x32xf32>
    %85 = arith.mulf %83, %84 : vector<4x32xf32>
    %86 = vector.broadcast %1 : vector<4x1xf32> to vector<4x32xf32>
    %87 = arith.addf %85, %86 : vector<4x32xf32>
    %cst_47 = arith.constant 0.000000e+00 : f32
    %88 = vector.broadcast %cst_47 : f32 to vector<4x32xf32>
    %89 = arith.maximumf %87, %88 : vector<4x32xf32>
    %90 = vector.extract_strided_slice %89 {offsets = [0, 0], sizes = [4, 16], strides = [1, 1]} : vector<4x32xf32> to vector<4x16xf32>
    %91 = vector.extract_strided_slice %89 {offsets = [0, 16], sizes = [4, 16], strides = [1, 1]} : vector<4x32xf32> to vector<4x16xf32>
    %92 = arith.addf %90, %91 : vector<4x16xf32>
    %cst_48 = arith.constant dense<0.000000e+00> : vector<4x8xf32>
    %93 = tpu.matmul %92, %2, %cst_48 {dimension_numbers = #tpu.dot_dimension_numbers<[1], [0], [0], [1], [0, 0, 1, 1], [], []>} : vector<4x16xf32>, vector<16x8xf32>, vector<4x8xf32> -> vector<4x8xf32>
    %c0_49 = arith.constant 0 : index
    %c48 = arith.constant 48 : index
    %94 = vector.load %arg7[%c0_49, %c48] : memref<4x64xf32, #tpu.memory_space<vmem>>, vector<4x8xf32>
    tpu.vector_store %arg7[%c0_49, %c48], %93 {strides = array<i32>} : memref<4x64xf32, #tpu.memory_space<vmem>>, vector<4x8xf32>,
    %c0_50 = arith.constant 0 : index
    %c0_51 = arith.constant 0 : index
    %c7 = arith.constant 7 : index
    %c0_52 = arith.constant 0 : index
    %95 = vector.load %arg1[%c0_50, %c0_51, %c7, %c0_52] : memref<2x4x8x32xf32, #tpu.memory_space<vmem>>, vector<1x4x1x32xf32>
    %96 = vector.shape_cast %95 : vector<1x4x1x32xf32> to vector<4x32xf32>
    %97 = vector.broadcast %0 : vector<4x1xf32> to vector<4x32xf32>
    %98 = arith.mulf %96, %97 : vector<4x32xf32>
    %99 = vector.broadcast %1 : vector<4x1xf32> to vector<4x32xf32>
    %100 = arith.addf %98, %99 : vector<4x32xf32>
    %cst_53 = arith.constant 0.000000e+00 : f32
    %101 = vector.broadcast %cst_53 : f32 to vector<4x32xf32>
    %102 = arith.maximumf %100, %101 : vector<4x32xf32>
    %103 = vector.extract_strided_slice %102 {offsets = [0, 0], sizes = [4, 16], strides = [1, 1]} : vector<4x32xf32> to vector<4x16xf32>
    %104 = vector.extract_strided_slice %102 {offsets = [0, 16], sizes = [4, 16], strides = [1, 1]} : vector<4x32xf32> to vector<4x16xf32>
    %105 = arith.addf %103, %104 : vector<4x16xf32>
    %cst_54 = arith.constant dense<0.000000e+00> : vector<4x8xf32>
    %106 = tpu.matmul %105, %2, %cst_54 {dimension_numbers = #tpu.dot_dimension_numbers<[1], [0], [0], [1], [0, 0, 1, 1], [], []>} : vector<4x16xf32>, vector<16x8xf32>, vector<4x8xf32> -> vector<4x8xf32>
    %c0_55 = arith.constant 0 : index
    %c56 = arith.constant 56 : index
    %107 = vector.load %arg7[%c0_55, %c56] : memref<4x64xf32, #tpu.memory_space<vmem>>, vector<4x8xf32>
    tpu.vector_store %arg7[%c0_55, %c56], %106 {strides = array<i32>} : memref<4x64xf32, #tpu.memory_space<vmem>>, vector<4x8xf32>,
    %c0_56 = arith.constant 0 : index
    %c0_57 = arith.constant 0 : index
    %108 = vector.load %arg7[%c0_56, %c0_57] : memref<4x64xf32, #tpu.memory_space<vmem>>, vector<4x64xf32>
    %cst_58 = arith.constant dense<0.000000e+00> : vector<8x64xf32>
    %109 = tpu.matmul %3, %108, %cst_58 {dimension_numbers = #tpu.dot_dimension_numbers<[1], [0], [0], [1], [0, 0, 1, 1], [], []>} : vector<8x4xf32>, vector<4x64xf32>, vector<8x64xf32> -> vector<8x64xf32>
    %c0_59 = arith.constant 0 : index
    %c0_60 = arith.constant 0 : index
    %c0_61 = arith.constant 0 : index
    %110 = vector.load %arg6[%c0_59, %c0_60, %c0_61] : memref<2x8x64xf32, #tpu.memory_space<vmem>>, vector<1x8x64xf32>
    %111 = vector.shape_cast %110 : vector<1x8x64xf32> to vector<8x64xf32>
    %112 = vector.shape_cast %109 : vector<8x64xf32> to vector<1x8x64xf32>
    tpu.vector_store %arg6[%c0_59, %c0_60, %c0_61], %112 {strides = array<i32>} : memref<2x8x64xf32, #tpu.memory_space<vmem>>, vector<1x8x64xf32>,
    %c1_62 = arith.constant 1 : index
    %c0_63 = arith.constant 0 : index
    %c0_64 = arith.constant 0 : index
    %c0_65 = arith.constant 0 : index
    %113 = vector.load %arg1[%c1_62, %c0_63, %c0_64, %c0_65] : memref<2x4x8x32xf32, #tpu.memory_space<vmem>>, vector<1x4x1x32xf32>
    %114 = vector.shape_cast %113 : vector<1x4x1x32xf32> to vector<4x32xf32>
    %115 = vector.broadcast %0 : vector<4x1xf32> to vector<4x32xf32>
    %116 = arith.mulf %114, %115 : vector<4x32xf32>
    %117 = vector.broadcast %1 : vector<4x1xf32> to vector<4x32xf32>
    %118 = arith.addf %116, %117 : vector<4x32xf32>
    %cst_66 = arith.constant 0.000000e+00 : f32
    %119 = vector.broadcast %cst_66 : f32 to vector<4x32xf32>
    %120 = arith.maximumf %118, %119 : vector<4x32xf32>
    %121 = vector.extract_strided_slice %120 {offsets = [0, 0], sizes = [4, 16], strides = [1, 1]} : vector<4x32xf32> to vector<4x16xf32>
    %122 = vector.extract_strided_slice %120 {offsets = [0, 16], sizes = [4, 16], strides = [1, 1]} : vector<4x32xf32> to vector<4x16xf32>
    %123 = arith.addf %121, %122 : vector<4x16xf32>
    %cst_67 = arith.constant dense<0.000000e+00> : vector<4x8xf32>
    %124 = tpu.matmul %123, %2, %cst_67 {dimension_numbers = #tpu.dot_dimension_numbers<[1], [0], [0], [1], [0, 0, 1, 1], [], []>} : vector<4x16xf32>, vector<16x8xf32>, vector<4x8xf32> -> vector<4x8xf32>
    %c0_68 = arith.constant 0 : index
    %c0_69 = arith.constant 0 : index
    %125 = vector.load %arg7[%c0_68, %c0_69] : memref<4x64xf32, #tpu.memory_space<vmem>>, vector<4x8xf32>
    tpu.vector_store %arg7[%c0_68, %c0_69], %124 {strides = array<i32>} : memref<4x64xf32, #tpu.memory_space<vmem>>, vector<4x8xf32>,
    %c1_70 = arith.constant 1 : index
    %c0_71 = arith.constant 0 : index
    %c1_72 = arith.constant 1 : index
    %c0_73 = arith.constant 0 : index
    %126 = vector.load %arg1[%c1_70, %c0_71, %c1_72, %c0_73] : memref<2x4x8x32xf32, #tpu.memory_space<vmem>>, vector<1x4x1x32xf32>
    %127 = vector.shape_cast %126 : vector<1x4x1x32xf32> to vector<4x32xf32>
    %128 = vector.broadcast %0 : vector<4x1xf32> to vector<4x32xf32>
    %129 = arith.mulf %127, %128 : vector<4x32xf32>
    %130 = vector.broadcast %1 : vector<4x1xf32> to vector<4x32xf32>
    %131 = arith.addf %129, %130 : vector<4x32xf32>
    %cst_74 = arith.constant 0.000000e+00 : f32
    %132 = vector.broadcast %cst_74 : f32 to vector<4x32xf32>
    %133 = arith.maximumf %131, %132 : vector<4x32xf32>
    %134 = vector.extract_strided_slice %133 {offsets = [0, 0], sizes = [4, 16], strides = [1, 1]} : vector<4x32xf32> to vector<4x16xf32>
    %135 = vector.extract_strided_slice %133 {offsets = [0, 16], sizes = [4, 16], strides = [1, 1]} : vector<4x32xf32> to vector<4x16xf32>
    %136 = arith.addf %134, %135 : vector<4x16xf32>
    %cst_75 = arith.constant dense<0.000000e+00> : vector<4x8xf32>
    %137 = tpu.matmul %136, %2, %cst_75 {dimension_numbers = #tpu.dot_dimension_numbers<[1], [0], [0], [1], [0, 0, 1, 1], [], []>} : vector<4x16xf32>, vector<16x8xf32>, vector<4x8xf32> -> vector<4x8xf32>
    %c0_76 = arith.constant 0 : index
    %c8_77 = arith.constant 8 : index
    %138 = vector.load %arg7[%c0_76, %c8_77] : memref<4x64xf32, #tpu.memory_space<vmem>>, vector<4x8xf32>
    tpu.vector_store %arg7[%c0_76, %c8_77], %137 {strides = array<i32>} : memref<4x64xf32, #tpu.memory_space<vmem>>, vector<4x8xf32>,
    %c1_78 = arith.constant 1 : index
    %c0_79 = arith.constant 0 : index
    %c2_80 = arith.constant 2 : index
    %c0_81 = arith.constant 0 : index
    %139 = vector.load %arg1[%c1_78, %c0_79, %c2_80, %c0_81] : memref<2x4x8x32xf32, #tpu.memory_space<vmem>>, vector<1x4x1x32xf32>
    %140 = vector.shape_cast %139 : vector<1x4x1x32xf32> to vector<4x32xf32>
    %141 = vector.broadcast %0 : vector<4x1xf32> to vector<4x32xf32>
    %142 = arith.mulf %140, %141 : vector<4x32xf32>
    %143 = vector.broadcast %1 : vector<4x1xf32> to vector<4x32xf32>
    %144 = arith.addf %142, %143 : vector<4x32xf32>
    %cst_82 = arith.constant 0.000000e+00 : f32
    %145 = vector.broadcast %cst_82 : f32 to vector<4x32xf32>
    %146 = arith.maximumf %144, %145 : vector<4x32xf32>
    %147 = vector.extract_strided_slice %146 {offsets = [0, 0], sizes = [4, 16], strides = [1, 1]} : vector<4x32xf32> to vector<4x16xf32>
    %148 = vector.extract_strided_slice %146 {offsets = [0, 16], sizes = [4, 16], strides = [1, 1]} : vector<4x32xf32> to vector<4x16xf32>
    %149 = arith.addf %147, %148 : vector<4x16xf32>
    %cst_83 = arith.constant dense<0.000000e+00> : vector<4x8xf32>
    %150 = tpu.matmul %149, %2, %cst_83 {dimension_numbers = #tpu.dot_dimension_numbers<[1], [0], [0], [1], [0, 0, 1, 1], [], []>} : vector<4x16xf32>, vector<16x8xf32>, vector<4x8xf32> -> vector<4x8xf32>
    %c0_84 = arith.constant 0 : index
    %c16_85 = arith.constant 16 : index
    %151 = vector.load %arg7[%c0_84, %c16_85] : memref<4x64xf32, #tpu.memory_space<vmem>>, vector<4x8xf32>
    tpu.vector_store %arg7[%c0_84, %c16_85], %150 {strides = array<i32>} : memref<4x64xf32, #tpu.memory_space<vmem>>, vector<4x8xf32>,
    %c1_86 = arith.constant 1 : index
    %c0_87 = arith.constant 0 : index
    %c3_88 = arith.constant 3 : index
    %c0_89 = arith.constant 0 : index
    %152 = vector.load %arg1[%c1_86, %c0_87, %c3_88, %c0_89] : memref<2x4x8x32xf32, #tpu.memory_space<vmem>>, vector<1x4x1x32xf32>
    %153 = vector.shape_cast %152 : vector<1x4x1x32xf32> to vector<4x32xf32>
    %154 = vector.broadcast %0 : vector<4x1xf32> to vector<4x32xf32>
    %155 = arith.mulf %153, %154 : vector<4x32xf32>
    %156 = vector.broadcast %1 : vector<4x1xf32> to vector<4x32xf32>
    %157 = arith.addf %155, %156 : vector<4x32xf32>
    %cst_90 = arith.constant 0.000000e+00 : f32
    %158 = vector.broadcast %cst_90 : f32 to vector<4x32xf32>
    %159 = arith.maximumf %157, %158 : vector<4x32xf32>
    %160 = vector.extract_strided_slice %159 {offsets = [0, 0], sizes = [4, 16], strides = [1, 1]} : vector<4x32xf32> to vector<4x16xf32>
    %161 = vector.extract_strided_slice %159 {offsets = [0, 16], sizes = [4, 16], strides = [1, 1]} : vector<4x32xf32> to vector<4x16xf32>
    %162 = arith.addf %160, %161 : vector<4x16xf32>
    %cst_91 = arith.constant dense<0.000000e+00> : vector<4x8xf32>
    %163 = tpu.matmul %162, %2, %cst_91 {dimension_numbers = #tpu.dot_dimension_numbers<[1], [0], [0], [1], [0, 0, 1, 1], [], []>} : vector<4x16xf32>, vector<16x8xf32>, vector<4x8xf32> -> vector<4x8xf32>
    %c0_92 = arith.constant 0 : index
    %c24_93 = arith.constant 24 : index
    %164 = vector.load %arg7[%c0_92, %c24_93] : memref<4x64xf32, #tpu.memory_space<vmem>>, vector<4x8xf32>
    tpu.vector_store %arg7[%c0_92, %c24_93], %163 {strides = array<i32>} : memref<4x64xf32, #tpu.memory_space<vmem>>, vector<4x8xf32>,
    %c1_94 = arith.constant 1 : index
    %c0_95 = arith.constant 0 : index
    %c4_96 = arith.constant 4 : index
    %c0_97 = arith.constant 0 : index
    %165 = vector.load %arg1[%c1_94, %c0_95, %c4_96, %c0_97] : memref<2x4x8x32xf32, #tpu.memory_space<vmem>>, vector<1x4x1x32xf32>
    %166 = vector.shape_cast %165 : vector<1x4x1x32xf32> to vector<4x32xf32>
    %167 = vector.broadcast %0 : vector<4x1xf32> to vector<4x32xf32>
    %168 = arith.mulf %166, %167 : vector<4x32xf32>
    %169 = vector.broadcast %1 : vector<4x1xf32> to vector<4x32xf32>
    %170 = arith.addf %168, %169 : vector<4x32xf32>
    %cst_98 = arith.constant 0.000000e+00 : f32
    %171 = vector.broadcast %cst_98 : f32 to vector<4x32xf32>
    %172 = arith.maximumf %170, %171 : vector<4x32xf32>
    %173 = vector.extract_strided_slice %172 {offsets = [0, 0], sizes = [4, 16], strides = [1, 1]} : vector<4x32xf32> to vector<4x16xf32>
    %174 = vector.extract_strided_slice %172 {offsets = [0, 16], sizes = [4, 16], strides = [1, 1]} : vector<4x32xf32> to vector<4x16xf32>
    %175 = arith.addf %173, %174 : vector<4x16xf32>
    %cst_99 = arith.constant dense<0.000000e+00> : vector<4x8xf32>
    %176 = tpu.matmul %175, %2, %cst_99 {dimension_numbers = #tpu.dot_dimension_numbers<[1], [0], [0], [1], [0, 0, 1, 1], [], []>} : vector<4x16xf32>, vector<16x8xf32>, vector<4x8xf32> -> vector<4x8xf32>
    %c0_100 = arith.constant 0 : index
    %c32_101 = arith.constant 32 : index
    %177 = vector.load %arg7[%c0_100, %c32_101] : memref<4x64xf32, #tpu.memory_space<vmem>>, vector<4x8xf32>
    tpu.vector_store %arg7[%c0_100, %c32_101], %176 {strides = array<i32>} : memref<4x64xf32, #tpu.memory_space<vmem>>, vector<4x8xf32>,
    %c1_102 = arith.constant 1 : index
    %c0_103 = arith.constant 0 : index
    %c5_104 = arith.constant 5 : index
    %c0_105 = arith.constant 0 : index
    %178 = vector.load %arg1[%c1_102, %c0_103, %c5_104, %c0_105] : memref<2x4x8x32xf32, #tpu.memory_space<vmem>>, vector<1x4x1x32xf32>
    %179 = vector.shape_cast %178 : vector<1x4x1x32xf32> to vector<4x32xf32>
    %180 = vector.broadcast %0 : vector<4x1xf32> to vector<4x32xf32>
    %181 = arith.mulf %179, %180 : vector<4x32xf32>
    %182 = vector.broadcast %1 : vector<4x1xf32> to vector<4x32xf32>
    %183 = arith.addf %181, %182 : vector<4x32xf32>
    %cst_106 = arith.constant 0.000000e+00 : f32
    %184 = vector.broadcast %cst_106 : f32 to vector<4x32xf32>
    %185 = arith.maximumf %183, %184 : vector<4x32xf32>
    %186 = vector.extract_strided_slice %185 {offsets = [0, 0], sizes = [4, 16], strides = [1, 1]} : vector<4x32xf32> to vector<4x16xf32>
    %187 = vector.extract_strided_slice %185 {offsets = [0, 16], sizes = [4, 16], strides = [1, 1]} : vector<4x32xf32> to vector<4x16xf32>
    %188 = arith.addf %186, %187 : vector<4x16xf32>
    %cst_107 = arith.constant dense<0.000000e+00> : vector<4x8xf32>
    %189 = tpu.matmul %188, %2, %cst_107 {dimension_numbers = #tpu.dot_dimension_numbers<[1], [0], [0], [1], [0, 0, 1, 1], [], []>} : vector<4x16xf32>, vector<16x8xf32>, vector<4x8xf32> -> vector<4x8xf32>
    %c0_108 = arith.constant 0 : index
    %c40_109 = arith.constant 40 : index
    %190 = vector.load %arg7[%c0_108, %c40_109] : memref<4x64xf32, #tpu.memory_space<vmem>>, vector<4x8xf32>
    tpu.vector_store %arg7[%c0_108, %c40_109], %189 {strides = array<i32>} : memref<4x64xf32, #tpu.memory_space<vmem>>, vector<4x8xf32>,
    %c1_110 = arith.constant 1 : index
    %c0_111 = arith.constant 0 : index
    %c6_112 = arith.constant 6 : index
    %c0_113 = arith.constant 0 : index
    %191 = vector.load %arg1[%c1_110, %c0_111, %c6_112, %c0_113] : memref<2x4x8x32xf32, #tpu.memory_space<vmem>>, vector<1x4x1x32xf32>
    %192 = vector.shape_cast %191 : vector<1x4x1x32xf32> to vector<4x32xf32>
    %193 = vector.broadcast %0 : vector<4x1xf32> to vector<4x32xf32>
    %194 = arith.mulf %192, %193 : vector<4x32xf32>
    %195 = vector.broadcast %1 : vector<4x1xf32> to vector<4x32xf32>
    %196 = arith.addf %194, %195 : vector<4x32xf32>
    %cst_114 = arith.constant 0.000000e+00 : f32
    %197 = vector.broadcast %cst_114 : f32 to vector<4x32xf32>
    %198 = arith.maximumf %196, %197 : vector<4x32xf32>
    %199 = vector.extract_strided_slice %198 {offsets = [0, 0], sizes = [4, 16], strides = [1, 1]} : vector<4x32xf32> to vector<4x16xf32>
    %200 = vector.extract_strided_slice %198 {offsets = [0, 16], sizes = [4, 16], strides = [1, 1]} : vector<4x32xf32> to vector<4x16xf32>
    %201 = arith.addf %199, %200 : vector<4x16xf32>
    %cst_115 = arith.constant dense<0.000000e+00> : vector<4x8xf32>
    %202 = tpu.matmul %201, %2, %cst_115 {dimension_numbers = #tpu.dot_dimension_numbers<[1], [0], [0], [1], [0, 0, 1, 1], [], []>} : vector<4x16xf32>, vector<16x8xf32>, vector<4x8xf32> -> vector<4x8xf32>
    %c0_116 = arith.constant 0 : index
    %c48_117 = arith.constant 48 : index
    %203 = vector.load %arg7[%c0_116, %c48_117] : memref<4x64xf32, #tpu.memory_space<vmem>>, vector<4x8xf32>
    tpu.vector_store %arg7[%c0_116, %c48_117], %202 {strides = array<i32>} : memref<4x64xf32, #tpu.memory_space<vmem>>, vector<4x8xf32>,
    %c1_118 = arith.constant 1 : index
    %c0_119 = arith.constant 0 : index
    %c7_120 = arith.constant 7 : index
    %c0_121 = arith.constant 0 : index
    %204 = vector.load %arg1[%c1_118, %c0_119, %c7_120, %c0_121] : memref<2x4x8x32xf32, #tpu.memory_space<vmem>>, vector<1x4x1x32xf32>
    %205 = vector.shape_cast %204 : vector<1x4x1x32xf32> to vector<4x32xf32>
    %206 = vector.broadcast %0 : vector<4x1xf32> to vector<4x32xf32>
    %207 = arith.mulf %205, %206 : vector<4x32xf32>
    %208 = vector.broadcast %1 : vector<4x1xf32> to vector<4x32xf32>
    %209 = arith.addf %207, %208 : vector<4x32xf32>
    %cst_122 = arith.constant 0.000000e+00 : f32
    %210 = vector.broadcast %cst_122 : f32 to vector<4x32xf32>
    %211 = arith.maximumf %209, %210 : vector<4x32xf32>
    %212 = vector.extract_strided_slice %211 {offsets = [0, 0], sizes = [4, 16], strides = [1, 1]} : vector<4x32xf32> to vector<4x16xf32>
    %213 = vector.extract_strided_slice %211 {offsets = [0, 16], sizes = [4, 16], strides = [1, 1]} : vector<4x32xf32> to vector<4x16xf32>
    %214 = arith.addf %212, %213 : vector<4x16xf32>
    %cst_123 = arith.constant dense<0.000000e+00> : vector<4x8xf32>
    %215 = tpu.matmul %214, %2, %cst_123 {dimension_numbers = #tpu.dot_dimension_numbers<[1], [0], [0], [1], [0, 0, 1, 1], [], []>} : vector<4x16xf32>, vector<16x8xf32>, vector<4x8xf32> -> vector<4x8xf32>
    %c0_124 = arith.constant 0 : index
    %c56_125 = arith.constant 56 : index
    %216 = vector.load %arg7[%c0_124, %c56_125] : memref<4x64xf32, #tpu.memory_space<vmem>>, vector<4x8xf32>
    tpu.vector_store %arg7[%c0_124, %c56_125], %215 {strides = array<i32>} : memref<4x64xf32, #tpu.memory_space<vmem>>, vector<4x8xf32>,
    %c0_126 = arith.constant 0 : index
    %c0_127 = arith.constant 0 : index
    %217 = vector.load %arg7[%c0_126, %c0_127] : memref<4x64xf32, #tpu.memory_space<vmem>>, vector<4x64xf32>
    %cst_128 = arith.constant dense<0.000000e+00> : vector<8x64xf32>
    %218 = tpu.matmul %3, %217, %cst_128 {dimension_numbers = #tpu.dot_dimension_numbers<[1], [0], [0], [1], [0, 0, 1, 1], [], []>} : vector<8x4xf32>, vector<4x64xf32>, vector<8x64xf32> -> vector<8x64xf32>
    %c1_129 = arith.constant 1 : index
    %c0_130 = arith.constant 0 : index
    %c0_131 = arith.constant 0 : index
    %219 = vector.load %arg6[%c1_129, %c0_130, %c0_131] : memref<2x8x64xf32, #tpu.memory_space<vmem>>, vector<1x8x64xf32>
    %220 = vector.shape_cast %219 : vector<1x8x64xf32> to vector<8x64xf32>
    %221 = vector.shape_cast %218 : vector<8x64xf32> to vector<1x8x64xf32>
    tpu.vector_store %arg6[%c1_129, %c0_130, %c0_131], %221 {strides = array<i32>} : memref<2x8x64xf32, #tpu.memory_space<vmem>>, vector<1x8x64xf32>,
    return
  }
  func.func @transform_0(%arg0: i32) -> (i32, i32, i32, i32) {
    %c0_i32 = arith.constant 0 : i32
    %c0_i32_0 = arith.constant 0 : i32
    %c0_i32_1 = arith.constant 0 : i32
    %c0_i32_2 = arith.constant 0 : i32
    return %arg0, %c0_i32, %c0_i32_0, %c0_i32_1 : i32, i32, i32, i32
  }
  func.func @transform_1(%arg0: i32) -> (i32, i32) {
    %c0_i32 = arith.constant 0 : i32
    %c0_i32_0 = arith.constant 0 : i32
    %c0_i32_1 = arith.constant 0 : i32
    return %c0_i32, %c0_i32_0 : i32, i32
  }
  func.func @transform_2(%arg0: i32) -> (i32, i32) {
    %c0_i32 = arith.constant 0 : i32
    %c0_i32_0 = arith.constant 0 : i32
    %c0_i32_1 = arith.constant 0 : i32
    return %c0_i32, %c0_i32_0 : i32, i32
  }
  func.func @transform_3(%arg0: i32) -> (i32, i32) {
    %c0_i32 = arith.constant 0 : i32
    %c0_i32_0 = arith.constant 0 : i32
    %c0_i32_1 = arith.constant 0 : i32
    return %c0_i32, %c0_i32_0 : i32, i32
  }
  func.func @transform_4(%arg0: i32) -> (i32, i32) {
    %c0_i32 = arith.constant 0 : i32
    %c0_i32_0 = arith.constant 0 : i32
    %c0_i32_1 = arith.constant 0 : i32
    return %c0_i32, %c0_i32_0 : i32, i32
  }
  func.func @transform_5(%arg0: i32) -> (i32, i32, i32) {
    %c0_i32 = arith.constant 0 : i32
    %c0_i32_0 = arith.constant 0 : i32
    %c0_i32_1 = arith.constant 0 : i32
    return %arg0, %c0_i32, %c0_i32_0 : i32, i32, i32
  }
}

</mosaic_0001>

<bundles_post_ra>
// kernel: tpu_custom_call.1
= control target key start
LH: loop header
LB: loop body
LE: loop exit
PB: predicated region body
PF: predicated region fallthrough
CT: control target
= control target key end

     0   :  { %10 = vsyncpa [#allocation4], 0  ;;  %s3464_s0 = inlined_call_operand.hbm [shape: f32[2,4,8,32], index: 0, kind: input, shape index: {}]   ;;  %s3465_s1 = inlined_call_operand.vmem [shape: f32[8,4], index: 1, kind: input, shape index: {}]   ;;  %s3466_s2 = inlined_call_operand.vmem [shape: f32[16,8], index: 2, kind: input, shape index: {}]   ;;  %s3467_s3 = inlined_call_operand.vmem [shape: f32[4,1], index: 3, kind: input, shape index: {}]   ;;  %s3468_s4 = inlined_call_operand.vmem [shape: f32[4,1], index: 4, kind: input, shape index: {}]   ;;  %s3469_s5 = inlined_call_operand.hbm [shape: f32[2,8,64], index: 5, kind: output, shape index: {}]  }
   0x1   :  { %11 = vsyncpa [#allocation5], 0  ;;  %s2515_s18 = smov [#allocation3]   ;;  %s2467_s22 = scalar_lea.hbm %s3464_s0, 1024 }
   0x2   :  { %s17_s19 = sshll.u32 %s2515_s18, 4  ;;  %p2468_p0 = scmp.ne.s32.totalorder %s3464_s0, %s2467_s22  ;;  %s18_s19 = int_to_ptr.vmem [resolvable:$true] %s17_s19 }
   0x3   :  { %p2471_p1 = scmp.lt.u32.totalorder %s2467_s22, %s3464_s0 }
   0x5   :  { %p2473_p2 = pnand %p2471_p1, %p2468_p0 }
   0x7   :  { %2476 = shalt.err (!%p2473_p2)
}
   0x8   :  { %s2477_s27 = scalar_lea.vmem %s18_s19, 1024  ;;  %p2482_p4 = scmp.lt.s32.totalorder %s18_s19, %s18_s19 }
   0x9   :  { %p2478_p3 = scmp.ne.s32.totalorder %s18_s19, %s2477_s27  ;;  %p2483_p5 = scmp.lt.s32.totalorder %s2477_s27, %s2477_s27 }
   0xb   :  { %p2484_p6 = por %p2483_p5, %p2482_p4 }
   0xd   :  { %p2485_p7 = pnand %p2484_p6, %p2478_p3 }
   0xf   :  { %2488 = shalt.err (!%p2485_p7)
}
  0x10   :  { %s2516_s28 = smov 128   ;;  %s2517_s29 = smov 8  }
  0x11   :  { %23 = dma.hbm_to_vmem [thread:$0]  %s3464_s0, 1024, %s18_s19, [#allocation4], %s2516_s28, %s2516_s28, %s2517_s29  }
  0x12   :  { %2511 = dma.done.wait [#allocation4], 1024  }
  0x13   :  { %2512 = vsyncadd [#allocation4], 4294966272  ;;  %v2518_v0 = vmov 0   ;;  %v35_v1 = vld [vmem:[%s3467_s3] sm:$0xf]  ;;  %s2519_s0 = smov 112  }
  0x14   :  { %2466 = vset.pattern.permute.xlu0 %v2518_v0  ;;  %v36_v2 = vld [vmem:[%s3468_s4] sm:$0xf]  ;;  %v40_v4 = vld [vmem:[#allocation3] sm:$0x1]  ;;  %v186_v5 = vld [vmem:[#allocation3 + $0x1] sm:$0x1] }
  0x15   :  { %46 = vperm.xlu0 %2466, %v35_v1   ;;  %v310_v6 = vld [vmem:[#allocation3 + $0x2] sm:$0x1]  ;;  %v434_v8 = vld [vmem:[#allocation3 + $0x3] sm:$0x1]  ;;  %v558_v15 = vld [vmem:[#allocation3 + $0x4] sm:$0x1] }
  0x16   :  { %v682_v18 = vld [vmem:[#allocation3 + $0x5] sm:$0x1]  ;;  %v806_v24 = vld [vmem:[#allocation3 + $0x6] sm:$0x1]  ;;  %v187_v27 = vld [vmem:[#allocation3 + $0x9] sm:$0x1] }
  0x17   :  { %v41_v34 = vld [vmem:[#allocation3 + $0x8] sm:$0x1]  ;;  %v43_v37 = vld [vmem:[#allocation3 + $0x18] sm:$0x1]  ;;  %v42_v44 = vld [vmem:[#allocation3 + $0x10] sm:$0x1] }
  0x18   :  { %v311_v48 = vld [vmem:[#allocation3 + $0xa] sm:$0x1]  ;;  %v435_v52 = vld [vmem:[#allocation3 + $0xb] sm:$0x1]  ;;  %v188_v54 = vld [vmem:[#allocation3 + $0x11] sm:$0x1] }
  0x19   :  { %61 = vperm.xlu0 %2466, %v36_v2   ;;  %v189_v60 = vld [vmem:[#allocation3 + $0x19] sm:$0x1]  ;;  %v313_v63 = vld [vmem:[#allocation3 + $0x1a] sm:$0x1]  ;;  %v1137_v0 = vld [vmem:[#allocation3 + $0x28] sm:$0x1] }
  0x1a   :  { %vm2521_vm0 = vmmov 0   ;;  %vm106_vm1 = vcmask 1042434   ;;  %vm103_vm2 = vcmask 1041409   ;;  %vm109_vm3 = vcmask 1043459   ;;  %s2524_s13 = smov 24   ;;  %s2525_s14 = smov 32  }
  0x1b   :  { %vm111_vm4 = vcmask 130048   ;;  %vm184_vm5 = vcmask 60416   ;;  %s2526_s15 = smov 40   ;;  %s2527_s16 = smov 48   ;;  %vm308_vm6 = vcmask 126016   ;;  %vm432_vm7 = vcmask 191616  }
  0x1c   :  { %s2528_s17 = smov 56   ;;  %vm556_vm8 = vcmask 257216   ;;  %vm680_vm9 = vcmask 322816   ;;  %vm804_vm10 = vcmask 388416   ;;  %vm928_vm11 = vcmask 454016  }
  0x1d   :  { %vm1052_vm12 = vcmask 519616   ;;  %vm1059_vm13 = vcmask 1043456   ;;  %vm1055_vm14 = vcmask 31744   ;;  %vm1133_vm15 = vcmask 523264  }
  0x94   :  { %v2581_v3 = vpop.permute.xlu0 %46 }
  0x95   :  { %3552 = vst [vmem:[#allocation9_spill] sm:$0xff] %v2581_v3  ;;  %v55_v7 = vmul.f32 %v2581_v3, %v40_v4  ;;  %v190_v10 = vmul.f32 %v186_v5, %v2581_v3  ;;  %v314_v12 = vmul.f32 %v310_v6, %v2581_v3  ;;  %v438_v14 = vmul.f32 %v434_v8, %v2581_v3  ;;  %v1258_v6 = vld [vmem:[#allocation3 + $0x39] sm:$0x1] }
  0x96   :  { %v562_v21 = vmul.f32 %v558_v15, %v2581_v3  ;;  %v2608_v22 = vrot.slane %v2581_v3, 1  ;;  %v686_v23 = vmul.f32 %v682_v18, %v2581_v3  ;;  %v810_v31 = vmul.f32 %v806_v24, %v2581_v3  ;;  %v1139_v15 = vld [vmem:[#allocation3 + $0x38] sm:$0x1]  ;;  %v1503_v18 = vld [vmem:[#allocation3 + $0x33] sm:$0x1] }
  0x97   :  { %v2630_v32 = vrot.slane %v2581_v3, 3  ;;  %v2648_v41 = vrot.slane %v2581_v3, 2  ;;  %v312_v24 = vld [vmem:[#allocation3 + $0x12] sm:$0x1] }
  0x98   :  { %v2584_v9 = vpop.permute.xlu0 %61  ;;  %v191_v33 = vmul.f32 %v187_v27, %v2608_v22  ;;  %v56_v42 = vmul.f32 %v2608_v22, %v41_v34  ;;  %v315_v53 = vmul.f32 %v311_v48, %v2608_v22  ;;  %v439_v59 = vmul.f32 %v435_v52, %v2608_v22  ;;  %v1379_v48 = vld [vmem:[#allocation3 + $0x2a] sm:$0x1]  ;;  %v1502_v52 = vld [vmem:[#allocation3 + $0x2b] sm:$0x1] }
  0x99   :  { %3553 = vst [vmem:[#allocation10_spill] sm:$0xff] %v2584_v9  ;;  %v2588_v11 = vadd.f32 %v2584_v9, %v55_v7  ;;  %v2592_v13 = vadd.f32 %v190_v10, %v2584_v9  ;;  %v2597_v17 = vadd.f32 %v314_v12, %v2584_v9  ;;  %v2601_v20 = vadd.f32 %v438_v14, %v2584_v9  ;;  %v1256_v7 = vld [vmem:[#allocation3 + $0x29] sm:$0x1]  ;;  %v1380_v14 = vld [vmem:[#allocation3 + $0x32] sm:$0x1] }
  0x9a   :  { %v2616_v26 = vadd.f32 %v562_v21, %v2584_v9  ;;  %v2619_v28 = vrot.slane %v2584_v9, 1  ;;  %v2623_v30 = vadd.f32 %v686_v23, %v2584_v9  ;;  %v2638_v36 = vadd.f32 %v810_v31, %v2584_v9  ;;  %v559_v23 = vld [vmem:[#allocation3 + $0xc] sm:$0x1] }
  0x9b   :  { %v3484_v16 = vmax.f32 %v2588_v11, 0.0  ;;  %v3478_v19 = vmax.f32 %v2592_v13, 0.0  ;;  %v3475_v25 = vmax.f32 %v2597_v17, 0.0  ;;  %v3473_v29 = vmax.f32 %v2601_v20, 0.0 }
  0x9c   :  { %v3472_v35 = vmax.f32 %v2616_v26, 0.0  ;;  %v2641_v38 = vrot.slane %v2584_v9, 3  ;;  %v3471_v39 = vmax.f32 %v2623_v30, 0.0  ;;  %v2645_v40 = vadd.f32 %v191_v33, %v2619_v28 }
  0x9d   :  { %82 = vrot.lane.b32.xlu1 %v3484_v16, %s2519_s0  ;;  %206 = vrot.lane.b32.xlu0 %v3478_v19, %s2519_s0  ;;  %v58_v43 = vmul.f32 %v2630_v32, %v43_v37  ;;  %v2659_v45 = vrot.slane %v2584_v9, 2  ;;  %v3470_v46 = vmax.f32 %v2638_v36, 0.0  ;;  %v2663_v47 = vadd.f32 %v2619_v28, %v56_v42  ;;  %v1871_v19 = vld [vmem:[#allocation3 + $0x2e] sm:$0x1]  ;;  %v1994_v16 = vld [vmem:[#allocation3 + $0x2f] sm:$0x1] }
  0x9e   :  { %v3483_v49 = vmax.f32 %v2645_v40, 0.0  ;;  %v57_v51 = vmul.f32 %v2648_v41, %v42_v44  ;;  %v2683_v58 = vadd.f32 %v315_v53, %v2619_v28  ;;  %v192_v61 = vmul.f32 %v188_v54, %v2648_v41 }
  0x9f   :  { %v2667_v50 = vadd.f32 %v2641_v38, %v58_v43  ;;  %v3491_v55 = vmax.f32 %v2663_v47, 0.0  ;;  %v2694_v62 = vadd.f32 %v439_v59, %v2619_v28  ;;  %v193_v4 = vmul.f32 %v189_v60, %v2630_v32  ;;  %v683_v60 = vld [vmem:[#allocation3 + $0xd] sm:$0x1] }
  0xa0   :  { %v2679_v56 = vadd.f32 %v2659_v45, %v57_v51  ;;  %v2698_v2 = vadd.f32 %v192_v61, %v2659_v45  ;;  %v3479_v5 = vmax.f32 %v2683_v58, 0.0  ;;  %v317_v8 = vmul.f32 %v313_v63, %v2630_v32  ;;  %v1504_v51 = vld [vmem:[#allocation3 + $0x3b] sm:$0x1]  ;;  %v436_v61 = vld [vmem:[#allocation3 + $0x13] sm:$0x1] }
  0xa1   :  { %330 = vrot.lane.b32.xlu1 %v3475_v25, %s2519_s0  ;;  %454 = vrot.lane.b32.xlu0 %v3473_v29, %s2519_s0  ;;  %v3489_v57 = vmax.f32 %v2667_v50, 0.0  ;;  %v2707_v10 = vadd.f32 %v193_v4, %v2641_v38  ;;  %v1141_v12 = vmul.f32 %v1137_v0, %v2608_v22  ;;  %v3474_v21 = vmax.f32 %v2694_v62, 0.0  ;;  %v561_v0 = vld [vmem:[#allocation3 + $0x1c] sm:$0x1] }
  0xa2   :  { %v3488_v1 = vmax.f32 %v2679_v56, 0.0  ;;  %v3482_v27 = vmax.f32 %v2698_v2, 0.0  ;;  %v2716_v31 = vadd.f32 %v317_v8, %v2641_v38  ;;  %v1262_v34 = vmul.f32 %v1258_v6, %v2630_v32 }
  0xa3   :  { %v2719_v33 = vadd.f32 %v1141_v12, %v2619_v28  ;;  %v1260_v37 = vmul.f32 %v1256_v7, %v2608_v22  ;;  %v1384_v42 = vmul.f32 %v1380_v14, %v2648_v41  ;;  %v1143_v43 = vmul.f32 %v1139_v15, %v2630_v32  ;;  %v1626_v12 = vld [vmem:[#allocation3 + $0x34] sm:$0x1] }
  0xa4   :  { %v1507_v44 = vmul.f32 %v1503_v18, %v2648_v41  ;;  %v3477_v53 = vmax.f32 %v2707_v10, 0.0  ;;  %v563_v54 = vmul.f32 %v559_v23, %v2608_v22  ;;  %v316_v59 = vmul.f32 %v312_v24, %v2648_v41  ;;  %v1381_v24 = vld [vmem:[#allocation3 + $0x3a] sm:$0x1] }
  0xa5   :  { %578 = vrot.lane.b32.xlu1 %v3472_v35, %s2519_s0  ;;  %702 = vrot.lane.b32.xlu0 %v3471_v39, %s2519_s0  ;;  %v2733_v63 = vadd.f32 %v1262_v34, %v2641_v38  ;;  %v2739_v4 = vadd.f32 %v1260_v37, %v2619_v28  ;;  %v2742_v6 = vadd.f32 %v1384_v42, %v2659_v45  ;;  %v1625_v34 = vld [vmem:[#allocation3 + $0x2c] sm:$0x1]  ;;  %v1748_v37 = vld [vmem:[#allocation3 + $0x2d] sm:$0x1]  ;;  %v3476_v42 = vmax.f32 %v2716_v31, 0.0 }
  0xa6   :  { %v2745_v7 = vadd.f32 %v1143_v43, %v2641_v38  ;;  %v2748_v8 = vadd.f32 %v1507_v44, %v2659_v45  ;;  %v2751_v14 = vadd.f32 %v316_v59, %v2659_v45  ;;  %v1383_v15 = vmul.f32 %v1379_v48, %v2608_v22 }
  0xa7   :  { %3554 = vst [vmem:[#allocation11_spill] sm:$0xff] %v2742_v6  ;;  %v1508_v18 = vmul.f32 %v1504_v51, %v2630_v32  ;;  %v1506_v23 = vmul.f32 %v1502_v52, %v2608_v22  ;;  %v2758_v43 = vadd.f32 %v563_v54, %v2619_v28  ;;  %v687_v44 = vmul.f32 %v683_v60, %v2608_v22  ;;  %v437_v60 = vld [vmem:[#allocation3 + $0x1b] sm:$0x1] }
  0xa8   :  { %3555 = vst [vmem:[#allocation12_spill] sm:$0xff] %v2748_v8  ;;  %v2766_v48 = vadd.f32 %v1383_v15, %v2619_v28  ;;  %v1630_v54 = vmul.f32 %v1626_v12, %v2648_v41  ;;  %v565_v59 = vmul.f32 %v561_v0, %v2630_v32  ;;  %v1629_v15 = vmul.f32 %v1625_v34, %v2608_v22  ;;  %v38_v12 = vld [vmem:[%s3466_s2 + $0x8] sm:$0xff] }
  0xa9   :  { %826 = vrot.lane.b32.xlu1 %v3470_v46, %s2519_s0  ;;  %208 = vrot.lane.b32.xlu0 %v3483_v49, %s2519_s0  ;;  %v440_v46 = vmul.f32 %v436_v61, %v2648_v41  ;;  %v2769_v51 = vadd.f32 %v1508_v18, %v2641_v38  ;;  %v2772_v52 = vadd.f32 %v1506_v23, %v2619_v28  ;;  %v37_v18 = vld [vmem:[%s3466_s2] sm:$0xff]  ;;  %v3480_v23 = vmax.f32 %v2751_v14, 0.0  ;;  %s2523_s2 = smov 16  }
  0xaa   :  { %3556 = vst [vmem:[#allocation13_spill] sm:$0xff] %v2766_v48  ;;  %v1385_v61 = vmul.f32 %v1381_v24, %v2630_v32  ;;  %v1752_v39 = vmul.f32 %v1748_v37, %v2608_v22  ;;  %v2790_v35 = vadd.f32 %v687_v44, %v2619_v28  ;;  %v560_v24 = vld [vmem:[#allocation3 + $0x14] sm:$0x1]  ;;  %v2796_v34 = vadd.f32 %v1630_v54, %v2659_v45  ;;  %v1749_v44 = vld [vmem:[#allocation3 + $0x35] sm:$0x1] }
  0xab   :  { %3557 = vst [vmem:[#allocation14_spill] sm:$0xff] %v2769_v51  ;;  %3558 = vst [vmem:[#allocation15_spill] sm:$0xff] %v2772_v52  ;;  %v2793_v0 = vadd.f32 %v440_v46, %v2659_v45  ;;  %v3481_v37 = vmax.f32 %v2758_v43, 0.0  ;;  %v441_v46 = vmul.f32 %v437_v60, %v2630_v32  ;;  %v2812_v54 = vpack.c.bf16 %v38_v12, %v37_v18  ;;  %v807_v60 = vld [vmem:[#allocation3 + $0xe] sm:$0x1] }
  0xac   :  { %3559 = vst [vmem:[#allocation16_spill] sm:$0xff] %v2796_v34  ;;  %v2800_v29 = vadd.f32 %v1385_v61, %v2641_v38  ;;  %v2806_v25 = vadd.f32 %v1752_v39, %v2619_v28  ;;  %v2818_v61 = vadd.f32 %v565_v59, %v2641_v38  ;;  %v3493_v39 = vmov 0.0|0.0  }
  0xad   :  { %84 = vrot.lane.b32.xlu1 %v3491_v55, %s2519_s0  ;;  %88 = vrot.lane.b32.xlu0 %v3489_v57, %s2519_s0  ;;  %v3486_v18 = vmov 0.0   ;;  %v1753_v59 = vmul.f32 %v1749_v44, %v2648_v41  ;;  %v1875_v49 = vmul.f32 %v1871_v19, %v2608_v22  ;;  %v811_v19 = vmul.f32 %v807_v60, %v2608_v22  ;;  %v931_v57 = vld [vmem:[#allocation3 + $0xf] sm:$0x1] }
  0xae   :  { %3560 = vst [vmem:[#allocation17_spill] sm:$0xff] %v2800_v29  ;;  %3562 = vst [vmem:[#allocation19_spill] sm:$0xff] %v2806_v25  ;;  %2403 = vmatprep.subr.bf16.mxu0 %v3493_v39  ;;  %2285 = vmatprep.mubr.msk.f32.mxu0 %vm2521_vm0, %v3486_v18  ;;  %v3498_v55 = vmax.f32 %v2818_v61, 0.0 }
  0xaf   :  { %2405 = vmatpush3.bf16.msra.mxu0 %v2812_v54  ;;  %2406 = vmatprep.subr.bf16.mxu1 %v3493_v39 }
  0xb0   :  { %2292 = vmatprep.mubr.msk.f32.mxu1 %vm2521_vm0, %v3486_v18  ;;  %2408 = vmatpush3.bf16.msra.mxu1 %v2812_v54  ;;  %v1873_v18 = vld [vmem:[#allocation3 + $0x3e] sm:$0x1] }
  0xb1   :  { %86 = vrot.lane.b32.xlu1 %v3488_v1, %s2519_s0  ;;  %332 = vrot.lane.b32.xlu0 %v3479_v5, %s2519_s0  ;;  %v3485_v5 = vmax.f32 %v2793_v0, 0.0 }
  0xb2   :  { %2409 = vmatprep.subr.bf16.mxu0 %v3493_v39  ;;  %2412 = vmatprep.subr.bf16.mxu1 %v3493_v39 }
  0xb5   :  { %210 = vrot.lane.b32.xlu1 %v3482_v27, %s2519_s0  ;;  %456 = vrot.lane.b32.xlu0 %v3474_v21, %s2519_s0  ;;  %v2803_v21 = vadd.f32 %v1629_v15, %v2619_v28  ;;  %v1872_v15 = vld [vmem:[#allocation3 + $0x36] sm:$0x1]  ;;  %v564_v27 = vmul.f32 %v560_v24, %v2648_v41 }
  0xb6   :  { %v1876_v44 = vmul.f32 %v1872_v15, %v2648_v41 }
  0xb7   :  { %3561 = vst [vmem:[#allocation18_spill] sm:$0xff] %v2803_v21  ;;  %v2861_v15 = vadd.f32 %v564_v27, %v2659_v45 }
  0xb8   :  { %v2865_v60 = vadd.f32 %v1876_v44, %v2659_v45  ;;  %v1877_v44 = vmul.f32 %v1873_v18, %v2630_v32 }
  0xb9   :  { %212 = vrot.lane.b32.xlu1 %v3477_v53, %s2519_s0  ;;  %336 = vrot.lane.b32.xlu0 %v3476_v42, %s2519_s0  ;;  %v1627_v42 = vld [vmem:[#allocation3 + $0x3c] sm:$0x1]  ;;  %v1750_v53 = vld [vmem:[#allocation3 + $0x3d] sm:$0x1] }
  0xba   :  { %v1631_v12 = vmul.f32 %v1627_v42, %v2630_v32  ;;  %v2842_v42 = vadd.f32 %v1753_v59, %v2659_v45  ;;  %v2857_v59 = vadd.f32 %v1875_v49, %v2619_v28  ;;  %3567 = vst [vmem:[#allocation24_spill] sm:$0xff] %v2865_v60  ;;  %v2870_v49 = vadd.f32 %v811_v19, %v2619_v28  ;;  %v685_v19 = vld [vmem:[#allocation3 + $0x1d] sm:$0x1] }
  0xbc   :  { %3563 = vst [vmem:[#allocation20_spill] sm:$0xff] %v2842_v42  ;;  %v2845_v24 = vadd.f32 %v1631_v12, %v2641_v38  ;;  %3566 = vst [vmem:[#allocation23_spill] sm:$0xff] %v2857_v59  ;;  %v1995_v12 = vld [vmem:[#allocation3 + $0x37] sm:$0x1] }
  0xbd   :  { %334 = vrot.lane.b32.xlu1 %v3480_v23, %s2519_s0  ;;  %580 = vrot.lane.b32.xlu0 %v3481_v37, %s2519_s0  ;;  %v2823_v23 = vadd.f32 %v441_v46, %v2641_v38  ;;  %v3490_v37 = vmax.f32 %v2790_v35, 0.0  ;;  %v1754_v46 = vmul.f32 %v1750_v53, %v2630_v32  ;;  %v684_v53 = vld [vmem:[#allocation3 + $0x15] sm:$0x1]  ;;  %v1999_v39 = vmul.f32 %v1995_v12, %v2648_v41 }
  0xbe   :  { %3564 = vst [vmem:[#allocation21_spill] sm:$0xff] %v2845_v24  ;;  %v688_v27 = vmul.f32 %v684_v53, %v2648_v41  ;;  %v3499_v12 = vmax.f32 %v2870_v49, 0.0 }
  0xbf   :  { %v3496_v1 = vmax.f32 %v2823_v23, 0.0  ;;  %v2894_v18 = vadd.f32 %v1999_v39, %v2659_v45 }
  0xc0   :  { %v2888_v53 = vadd.f32 %v688_v27, %v2659_v45 }
  0xc1   :  { %458 = vrot.lane.b32.xlu1 %v3485_v5, %s2519_s0  ;;  %704 = vrot.lane.b32.xlu0 %v3490_v37, %s2519_s0  ;;  %v2854_v5 = vadd.f32 %v1754_v46, %v2641_v38  ;;  %v1998_v37 = vmul.f32 %v1994_v16, %v2608_v22  ;;  %v1996_v46 = vld [vmem:[#allocation3 + $0x3f] sm:$0x1]  ;;  %v935_v16 = vmul.f32 %v931_v57, %v2608_v22 }
  0xc2   :  { %v2000_v60 = vmul.f32 %v1996_v46, %v2630_v32  ;;  %3570 = vst [vmem:[#allocation27_spill] sm:$0xff] %v2894_v18  ;;  %v689_v57 = vmul.f32 %v685_v19, %v2630_v32  ;;  %v808_v46 = vld [vmem:[#allocation3 + $0x16] sm:$0x1]  ;;  %v3504_v27 = vmax.f32 %v2888_v53, 0.0 }
  0xc3   :  { %3565 = vst [vmem:[#allocation22_spill] sm:$0xff] %v2854_v5  ;;  %v2877_v59 = vadd.f32 %v1998_v37, %v2619_v28  ;;  %v809_v37 = vld [vmem:[#allocation3 + $0x1e] sm:$0x1]  ;;  %v812_v19 = vmul.f32 %v808_v46, %v2648_v41 }
  0xc4   :  { %v2901_v22 = vadd.f32 %v2000_v60, %v2641_v38  ;;  %v813_v39 = vmul.f32 %v809_v37, %v2630_v32  ;;  %v930_v60 = vld [vmem:[#allocation3 + $0x7] sm:$0x1] }
  0xc5   :  { %460 = vrot.lane.b32.xlu1 %v3496_v1, %s2519_s0  ;;  %3568 = vst [vmem:[#allocation25_spill] sm:$0xff] %v2877_v59  ;;  %584 = vrot.lane.b32.xlu0 %v3498_v55, %s2519_s0  ;;  %v3500_v1 = vmax.f32 %v2861_v15, 0.0  ;;  %v2891_v59 = vadd.f32 %v1877_v44, %v2641_v38  ;;  %v2898_v55 = vadd.f32 %v935_v16, %v2619_v28 }
  0xc6   :  { %3571 = vst [vmem:[#allocation28_spill] sm:$0xff] %v2901_v22  ;;  %v2913_v28 = vadd.f32 %v689_v57, %v2641_v38  ;;  %v2917_v16 = vadd.f32 %v813_v39, %v2641_v38  ;;  %v934_v37 = vmul.f32 %v930_v60, %v2581_v3  ;;  %v932_v57 = vld [vmem:[#allocation3 + $0x17] sm:$0x1]  ;;  %v1136_v39 = vld [vmem:[#allocation3 + $0x20] sm:$0x1] }
  0xc7   :  { %3569 = vst [vmem:[#allocation26_spill] sm:$0xff] %v2891_v59  ;;  %v3503_v44 = vmax.f32 %v2898_v55, 0.0  ;;  %v936_v46 = vmul.f32 %v932_v57, %v2648_v41  ;;  %v1140_v60 = vmul.f32 %v1136_v39, %v2581_v3 }
  0xc8   :  { %v3507_v22 = vmax.f32 %v2917_v16, 0.0  ;;  %v2933_v18 = vadd.f32 %v934_v37, %v2584_v9  ;;  %v1378_v37 = vld [vmem:[#allocation3 + $0x22] sm:$0x1] }
  0xc9   :  { %582 = vrot.lane.b32.xlu1 %v3500_v1, %s2519_s0  ;;  %828 = vrot.lane.b32.xlu0 %v3499_v12, %s2519_s0  ;;  %v3508_v12 = vmax.f32 %v2913_v28, 0.0  ;;  %v2929_v1 = vadd.f32 %v812_v19, %v2659_v45  ;;  %v933_v19 = vld [vmem:[#allocation3 + $0x1f] sm:$0x1]  ;;  %v2949_v5 = vadd.f32 %v1140_v60, %v2584_v9  ;;  %v1382_v39 = vmul.f32 %v1378_v37, %v2581_v3  ;;  %v1624_v60 = vld [vmem:[#allocation3 + $0x24] sm:$0x1] }
  0xca   :  { %v3511_v59 = vmax.f32 %v2933_v18, 0.0  ;;  %v937_v57 = vmul.f32 %v933_v19, %v2630_v32  ;;  %v1628_v19 = vmul.f32 %v1624_v60, %v2581_v3 }
  0xcb   :  { %3572 = vst [vmem:[#allocation29_spill] sm:$0xff] %v2949_v5  ;;  %v3513_v24 = vmax.f32 %v2949_v5, 0.0  ;;  %v2965_v42 = vadd.f32 %v1382_v39, %v2584_v9  ;;  %v1138_v39 = vld [vmem:[#allocation3 + $0x30] sm:$0x1] }
  0xcc   :  { %v1142_v60 = vmul.f32 %v1138_v39, %v2648_v41 }
  0xcd   :  { %706 = vrot.lane.b32.xlu1 %v3504_v27, %s2519_s0  ;;  %952 = vrot.lane.b32.xlu0 %v3503_v44, %s2519_s0  ;;  %v3512_v44 = vmax.f32 %v2929_v1, 0.0  ;;  %v2945_v27 = vadd.f32 %v936_v46, %v2659_v45  ;;  %v1255_v46 = vld [vmem:[#allocation3 + $0x21] sm:$0x1]  ;;  %3573 = vst [vmem:[#allocation30_spill] sm:$0xff] %v2965_v42 }
  0xce   :  { %v1259_v32 = vmul.f32 %v1255_v46, %v2581_v3  ;;  %v2997_v5 = vadd.f32 %v1142_v60, %v2659_v45  ;;  %v3532_v60 = vmax.f32 %v2719_v33, 0.0 }
  0xd1   :  { %708 = vrot.lane.b32.xlu1 %v3508_v12, %s2519_s0  ;;  %832 = vrot.lane.b32.xlu0 %v3507_v22, %s2519_s0  ;;  %v3514_v22 = vmax.f32 %v2945_v27, 0.0  ;;  %v2961_v12 = vadd.f32 %v937_v57, %v2641_v38  ;;  %v1501_v38 = vld [vmem:[#allocation3 + $0x23] sm:$0x1]  ;;  %v2977_v57 = vadd.f32 %v1259_v32, %v2584_v9 }
  0xd2   :  { %v1505_v46 = vmul.f32 %v1501_v38, %v2581_v3  ;;  %v3578_v3 = vmax.f32 %v2679_v56, 0.0 }
  0xd3   :  { %v3533_v37 = vmax.f32 %v2961_v12, 0.0  ;;  %v3519_v32 = vmax.f32 %v2977_v57, 0.0 }
  0xd5   :  { %830 = vrot.lane.b32.xlu1 %v3512_v44, %s2519_s0  ;;  %950 = vrot.lane.b32.xlu0 %v3511_v59, %s2519_s0  ;;  %v3516_v59 = vmax.f32 %v2965_v42, 0.0  ;;  %v2981_v44 = vadd.f32 %v1628_v19, %v2584_v9 }
  0xd7   :  { %3574 = vst [vmem:[#allocation31_spill] sm:$0xff] %v2981_v44  ;;  %v3517_v19 = vmax.f32 %v2981_v44, 0.0 }
  0xd9   :  { %954 = vrot.lane.b32.xlu1 %v3514_v22, %s2519_s0  ;;  %1156 = vrot.lane.b32.xlu0 %v3513_v24, %s2519_s0  ;;  %v2993_v24 = vadd.f32 %v1505_v46, %v2584_v9  ;;  %v1257_v22 = vld [vmem:[#allocation3 + $0x31] sm:$0x1]  ;;  %v3527_v46 = vmax.f32 %v2997_v5, 0.0 }
  0xda   :  { %v1261_v38 = vmul.f32 %v1257_v22, %v2648_v41  ;;  %v3528_v41 = vmax.f32 %v2739_v4, 0.0  ;;  %v3521_v22 = vmax.f32 %v2745_v7, 0.0 }
  0xdb   :  { %3575 = vst [vmem:[#allocation32_spill] sm:$0xff] %v2993_v24  ;;  %v3518_v39 = vmax.f32 %v2993_v24, 0.0  ;;  %v3579_v24 = vmax.f32 %v2588_v11, 0.0 }
  0xdd   :  { %956 = vrot.lane.b32.xlu1 %v3533_v37, %s2519_s0  ;;  %1398 = vrot.lane.b32.xlu0 %v3516_v59, %s2519_s0  ;;  %v3009_v59 = vadd.f32 %v1261_v38, %v2659_v45  ;;  %v3520_v45 = vmax.f32 %v2733_v63, 0.0  ;;  %v3522_v38 = vmax.f32 %v2742_v6, 0.0  ;;  %v3580_v6 = vmax.f32 %v2645_v40, 0.0 }
  0xde   :  { %v3582_v40 = vmax.f32 %v2683_v58, 0.0 }
  0xe1   :  { %1275 = vrot.lane.b32.xlu1 %v3519_v32, %s2519_s0  ;;  %1644 = vrot.lane.b32.xlu0 %v3517_v19, %s2519_s0  ;;  %v3530_v19 = vmax.f32 %v3009_v59, 0.0  ;;  %v3524_v32 = vmax.f32 %v2748_v8, 0.0  ;;  %v3576_v8 = vmax.f32 %v2663_v47, 0.0 }
  0xe5   :  { %1521 = vrot.lane.b32.xlu1 %v3518_v39, %s2519_s0  ;;  %1160 = vrot.lane.b32.xlu0 %v3527_v46, %s2519_s0  ;;  %v3523_v39 = vmax.f32 %v2766_v48, 0.0 }
  0xe9   :  { %1158 = vrot.lane.b32.xlu1 %v3532_v60, %s2519_s0  ;;  %1279 = vrot.lane.b32.xlu0 %v3530_v19, %s2519_s0 }
  0xed   :  { %1277 = vrot.lane.b32.xlu1 %v3528_v41, %s2519_s0  ;;  %1281 = vrot.lane.b32.xlu0 %v3520_v45, %s2519_s0  ;;  %v3526_v45 = vmax.f32 %v2772_v52, 0.0 }
  0xf1   :  { %1162 = vrot.lane.b32.xlu1 %v3521_v22, %s2519_s0  ;;  %1402 = vrot.lane.b32.xlu0 %v3522_v38, %s2519_s0  ;;  %v3525_v22 = vmax.f32 %v2769_v51, 0.0  ;;  %v3529_v38 = vmax.f32 %v2800_v29, 0.0 }
  0xf5   :  { %1400 = vrot.lane.b32.xlu1 %v3523_v39, %s2519_s0  ;;  %1525 = vrot.lane.b32.xlu0 %v3524_v32, %s2519_s0  ;;  %v3531_v39 = vmax.f32 %v2796_v34, 0.0  ;;  %v3535_v32 = vmax.f32 %v2803_v21, 0.0 }
  0xf9   :  { %1523 = vrot.lane.b32.xlu1 %v3526_v45, %s2519_s0  ;;  %1527 = vrot.lane.b32.xlu0 %v3525_v22, %s2519_s0  ;;  %v3539_v22 = vmax.f32 %v2806_v25, 0.0  ;;  %v3577_v25 = vmax.f32 %v2667_v50, 0.0 }
  0xfd   :  { %1404 = vrot.lane.b32.xlu1 %v3529_v38, %s2519_s0  ;;  %1648 = vrot.lane.b32.xlu0 %v3531_v39, %s2519_s0 }
 0x101   :  { %1646 = vrot.lane.b32.xlu1 %v3535_v32, %s2519_s0 }
 0x105   :  { %1769 = vrot.lane.b32.xlu1 %v3539_v22, %s2519_s0 }
 0x10f   :  { %v83_v45 = vpop.permute.xlu1 %82  ;;  %v207_v46 = vpop.permute.xlu0 %206 }
 0x110   :  { %v94_v42 = vadd.f32 %v83_v45, %v3579_v24 }
 0x113   :  { %v331_v41 = vpop.permute.xlu1 %330  ;;  %v3073_v38 = vpop.permute.xlu0 %454 }
 0x117   :  { %v3075_v19 = vpop.permute.xlu1 %578  ;;  %v3077_v39 = vpop.permute.xlu0 %702 }
 0x11b   :  { %v3079_v60 = vpop.permute.xlu1 %826  ;;  %v209_v37 = vpop.permute.xlu0 %208 }
 0x11c   :  { %v219_v52 = vadd.f32 %v209_v37, %v3580_v6 }
 0x11f   :  { %v85_v51 = vpop.permute.xlu1 %84  ;;  %v89_v32 = vpop.permute.xlu0 %88 }
 0x120   :  { %v95_v44 = vadd.f32 %v85_v51, %v3576_v8  ;;  %v97_v22 = vadd.f32 %v89_v32, %v3577_v25 }
 0x122   :  { %v102_v34 = vrot.slane %v95_v44, 7  ;;  %v108_v47 = vrot.slane %v97_v22, 5  ;;  %v3585_v44 = vmax.f32 %v2707_v10, 0.0  ;;  %v3587_v22 = vmax.f32 %v2716_v31, 0.0 }
 0x123   :  { %v87_v21 = vpop.permute.xlu1 %86  ;;  %v333_v9 = vpop.permute.xlu0 %332  ;;  %v3589_v10 = vmax.f32 %v2597_v17, 0.0 }
 0x124   :  { %v96_v29 = vadd.f32 %v87_v21, %v3578_v3  ;;  %v104_v50 = vsel %vm103_vm2, %v102_v34, %v94_v42  ;;  %v3581_v3 = vmax.f32 %v2698_v2, 0.0  ;;  %v226_v21 = vrot.slane %v219_v52, 7 }
 0x125   :  { %v3583_v34 = vmov 0.0   ;;  %v3586_v52 = vmov 0.0|0.0  }
 0x126   :  { %v105_v48 = vrot.slane %v96_v29, 6  ;;  %v343_v29 = vadd.f32 %v333_v9, %v3582_v40 }
 0x127   :  { %v211_v25 = vpop.permute.xlu1 %210  ;;  %v457_v51 = vpop.permute.xlu0 %456 }
 0x128   :  { %v107_v8 = vsel %vm106_vm1, %v105_v48, %v104_v50  ;;  %v220_v56 = vadd.f32 %v211_v25, %v3581_v3  ;;  %v3584_v48 = vmax.f32 %v2592_v13, 0.0  ;;  %v350_v9 = vrot.slane %v343_v29, 7 }
 0x129   :  { %v110_v11 = vsel %vm109_vm3, %v108_v47, %v107_v8  ;;  %v3588_v13 = vmax.f32 %v2751_v14, 0.0  ;;  %v342_v3 = vadd.f32 %v331_v41, %v3589_v10  ;;  %v3591_v29 = vmax.f32 %v2793_v0, 0.0 }
 0x12a   :  { %2286 = vmatmul.mubr.msk.f32.vlgmr.msra.gmra.mrb[0].mxu0 %vm111_vm4, %v110_v11  ;;  %v228_v6 = vrot.slane %v220_v56, 6  ;;  %v218_v42 = vadd.f32 %v207_v46, %v3584_v48  ;;  %v3590_v56 = vmax.f32 %v2694_v62, 0.0  ;;  %v3598_v10 = vmax.f32 %v2790_v35, 0.0 }
 0x12b   :  { %v213_v24 = vpop.permute.xlu1 %212  ;;  %2411 = vmatpush3.bf16.msra.mxu0 %v2812_v54  ;;  %2299 = vmatprep.mubr.msk.f32.mxu0 %vm2521_vm0, %v3583_v34  ;;  %v337_v2 = vpop.permute.xlu0 %336  ;;  %v351_v31 = vsel %vm103_vm2, %v350_v9, %v342_v3 }
 0x12c   :  { %v221_v37 = vadd.f32 %v213_v24, %v3585_v44  ;;  %2415 = vmatprep.subr.bf16.mxu0 %v3586_v52  ;;  %v227_v32 = vsel %vm103_vm2, %v226_v21, %v218_v42  ;;  %v345_v47 = vadd.f32 %v337_v2, %v3587_v22  ;;  %v467_v11 = vadd.f32 %v457_v51, %v3590_v56 }
 0x12d   :  { %v229_v45 = vsel %vm106_vm1, %v228_v6, %v227_v32  ;;  %v3592_v24 = vmax.f32 %v2758_v43, 0.0  ;;  %v3593_v44 = vmax.f32 %v2601_v20, 0.0  ;;  %v3594_v32 = vmax.f32 %v2823_v23, 0.0 }
 0x12e   :  { %v230_v58 = vrot.slane %v221_v37, 5  ;;  %v354_v14 = vrot.slane %v345_v47, 5  ;;  %v474_v51 = vrot.slane %v467_v11, 7  ;;  %v3595_v47 = vmax.f32 %v2818_v61, 0.0 }
 0x12f   :  { %v335_v50 = vpop.permute.xlu1 %334  ;;  %v581_v25 = vpop.permute.xlu0 %580  ;;  %v466_v0 = vadd.f32 %v3073_v38, %v3593_v44  ;;  %v3596_v38 = vmax.f32 %v2861_v15, 0.0  ;;  %v3597_v23 = vmax.f32 %v2616_v26, 0.0  ;;  %v3603_v44 = vmax.f32 %v2917_v16, 0.0 }
 0x130   :  { %v344_v46 = vadd.f32 %v335_v50, %v3588_v13  ;;  %v231_v8 = vsel %vm109_vm3, %v230_v58, %v229_v45  ;;  %v591_v48 = vadd.f32 %v581_v25, %v3592_v24 }
 0x131   :  { %2293 = vmatmul.mubr.msk.f32.vlgmr.msra.gmra.mrb[0].mxu1 %vm111_vm4, %v231_v8  ;;  %v475_v43 = vsel %vm103_vm2, %v474_v51, %v466_v0  ;;  %v590_v8 = vadd.f32 %v3075_v19, %v3597_v23  ;;  %v3602_v51 = vmax.f32 %v2913_v28, 0.0  ;;  %v3605_v28 = vmax.f32 %v2638_v36, 0.0 }
 0x132   :  { %v352_v21 = vrot.slane %v344_v46, 6  ;;  %2414 = vmatpush3.bf16.msra.mxu1 %v2812_v54  ;;  %2306 = vmatprep.mubr.msk.f32.mxu1 %vm2521_vm0, %v3583_v34  ;;  %v598_v45 = vrot.slane %v591_v48, 7 }
 0x133   :  { %v459_v40 = vpop.permute.xlu1 %458  ;;  %2418 = vmatprep.subr.bf16.mxu1 %v3586_v52  ;;  %v705_v41 = vpop.permute.xlu0 %704 }
 0x134   :  { %v353_v17 = vsel %vm106_vm1, %v352_v21, %v351_v31  ;;  %v468_v6 = vadd.f32 %v459_v40, %v3591_v29  ;;  %v715_v3 = vadd.f32 %v705_v41, %v3598_v10  ;;  %v599_v61 = vsel %vm103_vm2, %v598_v45, %v590_v8 }
 0x135   :  { %v355_v62 = vsel %vm109_vm3, %v354_v14, %v353_v17  ;;  %v3599_v21 = vmax.f32 %v2888_v53, 0.0  ;;  %v3600_v40 = vmax.f32 %v2870_v49, 0.0  ;;  %v3609_v10 = vmax.f32 %v2961_v12, 0.0 }
 0x136   :  { %2300 = vmatmul.mubr.msk.f32.vlgmr.msra.gmra.mrb[2].mxu0 %vm111_vm4, %v355_v62  ;;  %v476_v42 = vrot.slane %v468_v6, 6  ;;  %v722_v14 = vrot.slane %v715_v3, 7  ;;  %v3601_v6 = vmax.f32 %v2623_v30, 0.0 }
 0x137   :  { %v461_v2 = vpop.permute.xlu1 %460  ;;  %2417 = vmatpush3.bf16.msra.mxu0 %v2812_v54  ;;  %2313 = vmatprep.mubr.msk.f32.mxu0 %vm2521_vm0, %v3583_v34  ;;  %v585_v37 = vpop.permute.xlu0 %584 }
 0x138   :  { %v469_v58 = vadd.f32 %v461_v2, %v3594_v32  ;;  %2421 = vmatprep.subr.bf16.mxu0 %v3586_v52  ;;  %v477_v22 = vsel %vm106_vm1, %v476_v42, %v475_v43  ;;  %v593_v50 = vadd.f32 %v585_v37, %v3595_v47  ;;  %v714_v53 = vadd.f32 %v3077_v39, %v3601_v6 }
 0x139   :  { %v3604_v39 = vmax.f32 %v2929_v1, 0.0  ;;  %v838_v43 = vadd.f32 %v3079_v60, %v3605_v28  ;;  %v3606_v1 = vmax.f32 %v2898_v55, 0.0  ;;  %v3612_v6 = vmax.f32 %v2739_v4, 0.0 }
 0x13a   :  { %v478_v9 = vrot.slane %v469_v58, 5  ;;  %v602_v11 = vrot.slane %v593_v50, 5  ;;  %v723_v49 = vsel %vm103_vm2, %v722_v14, %v714_v53  ;;  %v3607_v50 = vmax.f32 %v2945_v27, 0.0 }
 0x13b   :  { %v583_v25 = vpop.permute.xlu1 %582  ;;  %v829_v13 = vpop.permute.xlu0 %828  ;;  %v3611_v14 = vmax.f32 %v3009_v59, 0.0 }
 0x13c   :  { %v479_v20 = vsel %vm109_vm3, %v478_v9, %v477_v22  ;;  %v592_v46 = vadd.f32 %v583_v25, %v3596_v38  ;;  %v839_v17 = vadd.f32 %v829_v13, %v3600_v40  ;;  %v3608_v13 = vmax.f32 %v2933_v18, 0.0 }
 0x13d   :  { %2307 = vmatmul.mubr.msk.f32.vlgmr.msra.gmra.mrb[2].mxu1 %vm111_vm4, %v479_v20 }
 0x13e   :  { %v600_v56 = vrot.slane %v592_v46, 6  ;;  %2420 = vmatpush3.bf16.msra.mxu1 %v2812_v54  ;;  %2320 = vmatprep.mubr.msk.f32.mxu1 %vm2521_vm0, %v3583_v34  ;;  %v846_v42 = vrot.slane %v839_v17, 7 }
 0x13f   :  { %v707_v15 = vpop.permute.xlu1 %706  ;;  %2424 = vmatprep.subr.bf16.mxu1 %v3586_v52  ;;  %v953_v19 = vpop.permute.xlu0 %952 }
 0x140   :  { %v601_v26 = vsel %vm106_vm1, %v600_v56, %v599_v61  ;;  %v716_v31 = vadd.f32 %v707_v15, %v3599_v21  ;;  %v847_v16 = vsel %vm103_vm2, %v846_v42, %v838_v43  ;;  %v963_v47 = vadd.f32 %v953_v19, %v3606_v1 }
 0x141   :  { %v603_v35 = vsel %vm109_vm3, %v602_v11, %v601_v26 }
 0x142   :  { %2314 = vmatmul.mubr.msk.f32.vlgmr.msra.gmra.mrb[4].mxu0 %vm111_vm4, %v603_v35  ;;  %v724_v41 = vrot.slane %v716_v31, 6  ;;  %v970_v55 = vrot.slane %v963_v47, 7  ;;  %v3610_v31 = vmax.f32 %v2719_v33, 0.0  ;;  %v3617_v33 = vmax.f32 %v2977_v57, 0.0 }
 0x143   :  { %v709_v29 = vpop.permute.xlu1 %708  ;;  %2423 = vmatpush3.bf16.msra.mxu0 %v2812_v54  ;;  %2327 = vmatprep.mubr.msk.f32.mxu0 %vm2521_vm0, %v3583_v34  ;;  %v833_v62 = vpop.permute.xlu0 %832 }
 0x144   :  { %v717_v24 = vadd.f32 %v709_v29, %v3602_v51  ;;  %2337 = vmatprep.subr.mxu0 %v3583_v34  ;;  %v725_v2 = vsel %vm106_vm1, %v724_v41, %v723_v49  ;;  %v841_v0 = vadd.f32 %v833_v62, %v3603_v44  ;;  %v3613_v62 = vmax.f32 %v2997_v5, 0.0 }
 0x145   :  { %v3618_v5 = vmax.f32 %v2745_v7, 0.0 }
 0x146   :  { %v726_v48 = vrot.slane %v717_v24, 5  ;;  %v850_v45 = vrot.slane %v841_v0, 5  ;;  %v3614_v24 = vmax.f32 %v2733_v63, 0.0 }
 0x147   :  { %v831_v37 = vpop.permute.xlu1 %830  ;;  %v951_v32 = vpop.permute.xlu0 %950 }
 0x148   :  { %v727_v30 = vsel %vm109_vm3, %v726_v48, %v725_v2  ;;  %v840_v58 = vadd.f32 %v831_v37, %v3604_v39  ;;  %v962_v38 = vadd.f32 %v951_v32, %v3608_v13  ;;  %v3615_v48 = vld [vmem:[#allocation29_spill] sm:$0xff] }
 0x149   :  { %2321 = vmatmul.mubr.msk.f32.vlgmr.msra.gmra.mrb[4].mxu1 %vm111_vm4, %v727_v30  ;;  %v3616_v42 = vmax.f32 %v3615_v48, 0.0 }
 0x14a   :  { %v848_v9 = vrot.slane %v840_v58, 6  ;;  %2426 = vmatpush3.bf16.msra.mxu1 %v2812_v54  ;;  %2334 = vmatprep.mubr.msk.f32.mxu1 %vm2521_vm0, %v3583_v34  ;;  %v971_v27 = vsel %vm103_vm2, %v970_v55, %v962_v38 }
 0x14b   :  { %v955_v22 = vpop.permute.xlu1 %954  ;;  %2427 = vmatprep.subr.bf16.mxu1 %v3586_v52  ;;  %v1157_v60 = vpop.permute.xlu0 %1156 }
 0x14c   :  { %v849_v36 = vsel %vm106_vm1, %v848_v9, %v847_v16  ;;  %v964_v25 = vadd.f32 %v955_v22, %v3607_v50  ;;  %v1168_v2 = vadd.f32 %v1157_v60, %v3616_v42  ;;  %v3621_v60 = vld [vmem:[#allocation15_spill] sm:$0xff]  ;;  %v3631_v42 = vld [vmem:[#allocation20_spill] sm:$0xff] }
 0x14d   :  { %v851_v20 = vsel %vm109_vm3, %v850_v45, %v849_v36  ;;  %v3619_v45 = vld [vmem:[#allocation13_spill] sm:$0xff]  ;;  %v3622_v50 = vmax.f32 %v3621_v60, 0.0 }
 0x14e   :  { %2328 = vmatmul.mubr.msk.f32.vlgmr.msra.gmra.mrb[6].mxu0 %vm111_vm4, %v851_v20  ;;  %v972_v46 = vrot.slane %v964_v25, 6  ;;  %v3620_v22 = vmax.f32 %v3619_v45, 0.0  ;;  %v3623_v20 = vld [vmem:[#allocation11_spill] sm:$0xff]  ;;  %v3638_v60 = vld [vmem:[#allocation25_spill] sm:$0xff] }
 0x14f   :  { %v957_v23 = vpop.permute.xlu1 %956  ;;  %2339 = vmatprep.mubr.msk.f32.mxu0 %vm2521_vm0, %v3583_v34  ;;  %v1399_v8 = vpop.permute.xlu0 %1398  ;;  %v3624_v13 = vmax.f32 %v3623_v20, 0.0 }
 0x150   :  { %v965_v3 = vadd.f32 %v957_v23, %v3609_v10  ;;  %v973_v61 = vsel %vm106_vm1, %v972_v46, %v971_v27  ;;  %v3625_v46 = vld [vmem:[#allocation30_spill] sm:$0xff]  ;;  %v3627_v10 = vld [vmem:[#allocation32_spill] sm:$0xff] }
 0x151   :  { %v3626_v23 = vmax.f32 %v3625_v46, 0.0 }
 0x152   :  { %v974_v56 = vrot.slane %v965_v3, 5  ;;  %v3628_v3 = vmax.f32 %v3627_v10, 0.0 }
 0x153   :  { %v1276_v11 = vpop.permute.xlu1 %1275  ;;  %v3206_v15 = vpop.permute.xlu0 %1644  ;;  %v1410_v55 = vadd.f32 %v1399_v8, %v3626_v23  ;;  %v3640_v23 = vld [vmem:[#allocation27_spill] sm:$0xff] }
 0x154   :  { %v975_v18 = vsel %vm109_vm3, %v974_v56, %v973_v61  ;;  %v1287_v44 = vadd.f32 %v1276_v11, %v3617_v33  ;;  %v1747_v33 = vld [vmem:[#allocation3 + $0x25] sm:$0x1] }
 0x155   :  { %2335 = vmatmul.mubr.msk.f32.vlgmr.msra.gmra.mrb[6].mxu1 %vm111_vm4, %v975_v18 }
 0x156   :  { %2429 = vmatpush3.bf16.msra.mxu1 %v2812_v54  ;;  %2346 = vmatprep.mubr.msk.f32.mxu1 %vm2521_vm0, %v3583_v34 }
 0x157   :  { %v1522_v26 = vpop.permute.xlu1 %1521  ;;  %2433 = vmatprep.subr.bf16.mxu1 %v3586_v52  ;;  %v1161_v12 = vpop.permute.xlu0 %1160 }
 0x158   :  { %v1170_v51 = vadd.f32 %v1161_v12, %v3613_v62  ;;  %v1533_v27 = vadd.f32 %v1522_v26, %v3628_v3  ;;  %v3629_v12 = vld [vmem:[#allocation17_spill] sm:$0xff]  ;;  %v3641_v3 = vld [vmem:[#allocation28_spill] sm:$0xff] }
 0x15a   :  { %v1178_v58 = vrot.slane %v1170_v51, 6 }
 0x15b   :  { %v1159_v19 = vpop.permute.xlu1 %1158  ;;  %v1280_v21 = vpop.permute.xlu0 %1279 }
 0x15c   :  { %v1169_v35 = vadd.f32 %v1159_v19, %v3610_v31  ;;  %v1289_v40 = vadd.f32 %v1280_v21, %v3611_v14  ;;  %v3630_v19 = vmax.f32 %v3629_v12, 0.0 }
 0x15e   :  { %v1176_v41 = vrot.slane %v1169_v35, 7  ;;  %v1297_v0 = vrot.slane %v1289_v40, 6 }
 0x15f   :  { %v1278_v17 = vpop.permute.xlu1 %1277  ;;  %v1282_v29 = vpop.permute.xlu0 %1281 }
 0x160   :  { %v1288_v53 = vadd.f32 %v1278_v17, %v3612_v6  ;;  %v1290_v49 = vadd.f32 %v1282_v29, %v3614_v24  ;;  %v1177_v30 = vsel %vm103_vm2, %v1176_v41, %v1168_v2  ;;  %v1761_v2 = vmax.f32 %v3631_v42, 0.0 }
 0x161   :  { %v1179_v57 = vsel %vm106_vm1, %v1178_v58, %v1177_v30  ;;  %v3633_v30 = vld [vmem:[#allocation21_spill] sm:$0xff] }
 0x162   :  { %v1295_v59 = vrot.slane %v1288_v53, 7  ;;  %v1299_v32 = vrot.slane %v1290_v49, 5 }
 0x163   :  { %v1163_v37 = vpop.permute.xlu1 %1162  ;;  %v1403_v47 = vpop.permute.xlu0 %1402 }
 0x164   :  { %v1296_v4 = vsel %vm103_vm2, %v1295_v59, %v1287_v44  ;;  %v1171_v39 = vadd.f32 %v1163_v37, %v3618_v5  ;;  %v1412_v38 = vadd.f32 %v1403_v47, %v3624_v13  ;;  %v3639_v13 = vld [vmem:[#allocation26_spill] sm:$0xff] }
 0x165   :  { %v1298_v63 = vsel %vm106_vm1, %v1297_v0, %v1296_v4  ;;  %v3632_v0 = vld [vmem:[#allocation9_spill] sm:$0xff]  ;;  %v3634_v4 = vld [vmem:[#allocation10_spill] sm:$0xff] }
 0x166   :  { %v1180_v28 = vrot.slane %v1171_v39, 5  ;;  %v3233_v43 = vsel %vm109_vm3, %v1299_v32, %v1298_v63  ;;  %v1420_v31 = vrot.slane %v1412_v38, 6  ;;  %v1751_v37 = vmul.f32 %v1747_v33, %v3632_v0  ;;  %v3646_v33 = vld [vmem:[#allocation31_spill] sm:$0xff] }
 0x167   :  { %v1401_v9 = vpop.permute.xlu1 %1400  ;;  %v1639_v32 = vmax.f32 %v3633_v30, 0.0  ;;  %v1885_v38 = vmax.f32 %v3639_v13, 0.0 }
 0x168   :  { %v1181_v16 = vsel %vm109_vm3, %v1180_v28, %v1179_v57  ;;  %v1411_v1 = vadd.f32 %v1401_v9, %v3620_v22  ;;  %v3279_v5 = vadd.f32 %v1751_v37, %v3634_v4  ;;  %v1870_v28 = vld [vmem:[#allocation3 + $0x26] sm:$0x1]  ;;  %v3635_v57 = vld [vmem:[#allocation22_spill] sm:$0xff] }
 0x169   :  { %2347 = vmatmul.mubr.msk.f32.vlgmr.msra.gmra.mrb[8].mxu1 %vm111_vm4, %v1181_v16  ;;  %v1762_v9 = vmax.f32 %v3635_v57, 0.0  ;;  %v3636_v16 = vld [vmem:[#allocation23_spill] sm:$0xff]  ;;  %v1874_v22 = vmul.f32 %v1870_v28, %v3632_v0 }
 0x16a   :  { %2435 = vmatpush3.bf16.msra.mxu1 %v2812_v54  ;;  %2360 = vmatprep.mubr.msk.f32.mxu1 %vm2521_vm0, %v3583_v34  ;;  %v1418_v36 = vrot.slane %v1411_v1, 7  ;;  %v1759_v58 = vmax.f32 %v3279_v5, 0.0  ;;  %v1883_v45 = vmax.f32 %v3636_v16, 0.0  ;;  %v3637_v1 = vld [vmem:[#allocation24_spill] sm:$0xff] }
 0x16b   :  { %v1524_v7 = vpop.permute.xlu1 %1523  ;;  %2439 = vmatprep.subr.bf16.mxu1 %v3586_v52  ;;  %v1884_v47 = vmax.f32 %v3637_v1, 0.0 }
 0x16c   :  { %v1534_v25 = vadd.f32 %v1524_v7, %v3622_v50  ;;  %v1419_v11 = vsel %vm103_vm2, %v1418_v36, %v1410_v55  ;;  %v3300_v7 = vadd.f32 %v1874_v22, %v3634_v4  ;;  %v1993_v36 = vld [vmem:[#allocation3 + $0x27] sm:$0x1]  ;;  %v2006_v50 = vmax.f32 %v3638_v60, 0.0 }
 0x16d   :  { %v1421_v14 = vsel %vm106_vm1, %v1420_v31, %v1419_v11  ;;  %v2007_v55 = vmax.f32 %v3640_v23, 0.0 }
 0x16e   :  { %v1541_v56 = vrot.slane %v1534_v25, 7  ;;  %v1997_v25 = vmul.f32 %v1993_v36, %v3632_v0  ;;  %v1882_v20 = vmax.f32 %v3300_v7, 0.0 }
 0x16f   :  { %v1405_v61 = vpop.permute.xlu1 %1404 }
 0x170   :  { %v3254_v18 = vsel %vm103_vm2, %v1541_v56, %v1533_v27  ;;  %v1413_v21 = vadd.f32 %v1405_v61, %v3630_v19  ;;  %v3313_v46 = vadd.f32 %v1997_v25, %v3634_v4  ;;  %v2008_v27 = vmax.f32 %v3641_v3, 0.0  ;;  %v1526_v19 = vpop.permute.xlu0 %1525 }
 0x172   :  { %v1422_v35 = vrot.slane %v1413_v21, 5  ;;  %v2005_v10 = vmax.f32 %v3313_v46, 0.0 }
 0x173   :  { %v1647_v31 = vpop.permute.xlu1 %1646 }
 0x174   :  { %v1423_v40 = vsel %vm109_vm3, %v1422_v35, %v1421_v14  ;;  %v1528_v21 = vpop.permute.xlu0 %1527 }
 0x175   :  { %2361 = vmatmul.mubr.msk.f32.vlgmr.msra.gmra.mrb[10].mxu1 %vm111_vm4, %v1423_v40 }
 0x176   :  { %2441 = vmatpush3.bf16.msra.mxu1 %v2812_v54  ;;  %2374 = vmatprep.mubr.msk.f32.mxu1 %vm2521_vm0, %v3583_v34 }
 0x177   :  { %2445 = vmatprep.subr.bf16.mxu1 %v3586_v52  ;;  %v1770_v40 = vpop.permute.xlu1 %1769 }
 0x178   :  { %v1649_v35 = vpop.permute.xlu0 %1648 }
 0x1fd   :  { %v180_v8 = vpop.f32.mrb[0].mxu0 }
 0x1fe   :  { %185 = vst.msk [vmem:[#allocation2] sm:$0xf] %vm184_vm5, %v180_v8  ;;  %v2287_v26 = vpop.f32.mrb[1].mxu0 }
 0x204   :  { %v300_v17 = vpop.f32.mrb[0].mxu1 }
 0x205   :  { %305 = vrot.lane.b32.xlu0 %v300_v17, %s2517_s29  ;;  %v2294_v41 = vpop.f32.mrb[1].mxu1 }
 0x209   :  { %v424_v29 = vpop.f32.mrb[2].mxu0 }
 0x20a   :  { %429 = vrot.lane.b32.xlu1 %v424_v29, %s2523_s2  ;;  %v2301_v6 = vpop.f32.mrb[3].mxu0  ;;  %v3642_v29 = vld [vmem:[#allocation18_spill] sm:$0xff] }
 0x20b   :  { %v3643_v6 = vmax.f32 %v3642_v29, 0.0 }
 0x210   :  { %v548_v53 = vpop.f32.mrb[2].mxu1 }
 0x211   :  { %553 = vrot.lane.b32.xlu0 %v548_v53, %s2524_s13  ;;  %v2308_v62 = vpop.f32.mrb[3].mxu1  ;;  %v1657_v53 = vadd.f32 %v1647_v31, %v3643_v6  ;;  %v3652_v6 = vld [vmem:[#allocation19_spill] sm:$0xff] }
 0x215   :  { %v672_v51 = vpop.f32.mrb[4].mxu0 }
 0x216   :  { %677 = vrot.lane.b32.xlu1 %v672_v51, %s2525_s14  ;;  %v2315_v24 = vpop.f32.mrb[5].mxu0  ;;  %v1664_v51 = vrot.slane %v1657_v53, 7  ;;  %v3653_v53 = vmax.f32 %v3652_v6, 0.0 }
 0x217   :  { %v3644_v24 = vld [vmem:[#allocation16_spill] sm:$0xff] }
 0x21c   :  { %v796_v49 = vpop.f32.mrb[4].mxu1 }
 0x21d   :  { %801 = vrot.lane.b32.xlu0 %v796_v49, %s2526_s15  ;;  %v2322_v48 = vpop.f32.mrb[5].mxu1  ;;  %v3645_v49 = vmax.f32 %v3644_v24, 0.0 }
 0x21f   :  { %v1658_v48 = vadd.f32 %v1649_v35, %v3645_v49 }
 0x221   :  { %1771 = vrot.lane.b32.xlu0 %v1761_v2, %s2519_s0  ;;  %v920_v44 = vpop.f32.mrb[6].mxu0 }
 0x222   :  { %925 = vrot.lane.b32.xlu1 %v920_v44, %s2527_s16  ;;  %v2329_v59 = vpop.f32.mrb[7].mxu0  ;;  %v3647_v44 = vmax.f32 %v3646_v33, 0.0 }
 0x224   :  { %v1656_v59 = vadd.f32 %v3206_v15, %v3647_v44 }
 0x226   :  { %1650 = vrot.lane.b32.xlu1 %v1639_v32, %s2519_s0  ;;  %v1665_v4 = vsel %vm103_vm2, %v1664_v51, %v1656_v59 }
 0x228   :  { %v1044_v39 = vpop.f32.mrb[6].mxu1 }
 0x229   :  { %1049 = vrot.lane.b32.xlu0 %v1044_v39, %s2528_s17  ;;  %v2336_v63 = vpop.f32.mrb[7].mxu1 }
 0x22a   :  { %1767 = vrot.lane.b32.xlu1 %v1759_v58, %s2519_s0  ;;  %v1666_v63 = vrot.slane %v1658_v48, 6 }
 0x22c   :  { %v1667_v36 = vsel %vm106_vm1, %v1666_v63, %v1665_v4 }
 0x22d   :  { %1773 = vrot.lane.b32.xlu0 %v1762_v9, %s2519_s0 }
 0x22e   :  { %1892 = vrot.lane.b32.xlu1 %v1883_v45, %s2519_s0 }
 0x231   :  { %1894 = vrot.lane.b32.xlu0 %v1884_v47, %s2519_s0 }
 0x232   :  { %2015 = vrot.lane.b32.xlu1 %v2006_v50, %s2519_s0 }
 0x235   :  { %1890 = vrot.lane.b32.xlu0 %v1882_v20, %s2519_s0 }
 0x236   :  { %1896 = vrot.lane.b32.xlu1 %v1885_v38, %s2519_s0 }
 0x239   :  { %2017 = vrot.lane.b32.xlu0 %v2007_v55, %s2519_s0 }
 0x23a   :  { %2013 = vrot.lane.b32.xlu1 %v2005_v10, %s2519_s0 }
 0x23c   :  { %v1250_v56 = vpop.f32.mrb[8].mxu1 }
 0x23d   :  { %2019 = vrot.lane.b32.xlu0 %v2008_v27, %s2519_s0  ;;  %v2348_v61 = vpop.f32.mrb[9].mxu1 }
 0x248   :  { %v1492_v11 = vpop.f32.mrb[10].mxu1 }
 0x249   :  { %1497 = vrot.lane.b32.xlu0 %v1492_v11, %s2523_s2  ;;  %v2362_v12 = vpop.f32.mrb[11].mxu1  ;;  %v3648_v11 = vld [vmem:[#allocation12_spill] sm:$0xff] }
 0x24a   :  { %v3649_v12 = vmax.f32 %v3648_v11, 0.0 }
 0x24c   :  { %v1535_v31 = vadd.f32 %v1526_v19, %v3649_v12 }
 0x24e   :  { %v1543_v16 = vrot.slane %v1535_v31, 6 }
 0x250   :  { %v1544_v51 = vsel %vm106_vm1, %v1543_v16, %v3254_v18 }
 0x277   :  { %v306_v14 = vpop.permute.xlu0 %305 }
 0x278   :  { %309 = vst.msk [vmem:[#allocation2] sm:$0xf] %vm308_vm6, %v306_v14 }
 0x27c   :  { %v430_v8 = vpop.permute.xlu1 %429 }
 0x27d   :  { %433 = vst.msk [vmem:[#allocation2] sm:$0xf] %vm432_vm7, %v430_v8 }
 0x283   :  { %v554_v26 = vpop.permute.xlu0 %553 }
 0x284   :  { %557 = vst.msk [vmem:[#allocation2] sm:$0xf] %vm556_vm8, %v554_v26 }
 0x288   :  { %v678_v17 = vpop.permute.xlu1 %677 }
 0x289   :  { %681 = vst.msk [vmem:[#allocation2] sm:$0xf] %vm680_vm9, %v678_v17 }
 0x28f   :  { %v802_v41 = vpop.permute.xlu0 %801 }
 0x290   :  { %805 = vst.msk [vmem:[#allocation2] sm:$0xf] %vm804_vm10, %v802_v41  ;;  %v3650_v41 = vld [vmem:[#allocation14_spill] sm:$0xff] }
 0x291   :  { %v3651_v19 = vmax.f32 %v3650_v41, 0.0 }
 0x293   :  { %v1772_v0 = vpop.permute.xlu0 %1771  ;;  %v1536_v29 = vadd.f32 %v1528_v21, %v3651_v19 }
 0x294   :  { %v926_v62 = vpop.permute.xlu1 %925  ;;  %v1781_v24 = vadd.f32 %v1772_v0, %v1761_v2 }
 0x295   :  { %929 = vst.msk [vmem:[#allocation2] sm:$0xf] %vm928_vm11, %v926_v62  ;;  %v1545_v5 = vrot.slane %v1536_v29, 5 }
 0x296   :  { %v1789_v13 = vrot.slane %v1781_v24, 6 }
 0x298   :  { %v1651_v37 = vpop.permute.xlu1 %1650 }
 0x299   :  { %v1659_v39 = vadd.f32 %v1651_v37, %v1639_v32  ;;  %v3361_v32 = vld [vmem:[%s3465_s1] sm:$0xff]  ;;  %s2529_s1 = smov [#allocation6]  }
 0x29a   :  { %s2197_s20 = sshll.u32 %s2529_s1, 4  ;;  %s2198_s20 = int_to_ptr.vmem [resolvable:$true] %s2197_s20 }
 0x29b   :  { %v1668_v28 = vrot.slane %v1659_v39, 5  ;;  %v1050_v22 = vpop.permute.xlu0 %1049  ;;  %s2489_s21 = scalar_lea.vmem %s2198_s20, 256  ;;  %p2494_p9 = scmp.lt.s32.totalorder %s2198_s20, %s2198_s20 }
 0x29c   :  { %1053 = vst.msk [vmem:[#allocation2] sm:$0xf] %vm1052_vm12, %v1050_v22  ;;  %v1768_v25 = vpop.permute.xlu1 %1767  ;;  %p2490_p8 = scmp.ne.s32.totalorder %s2198_s20, %s2489_s21  ;;  %p2495_p10 = scmp.lt.s32.totalorder %s2489_s21, %s2489_s21 }
 0x29d   :  { %v1669_v61 = vsel %vm109_vm3, %v1668_v28, %v1667_v36  ;;  %v1779_v1 = vadd.f32 %v1768_v25, %v1759_v58 }
 0x29e   :  { %2375 = vmatmul.mubr.msk.f32.vlgmr.msra.gmra.mrb[12].mxu1 %vm111_vm4, %v1669_v61  ;;  %p2496_p11 = por %p2495_p10, %p2494_p9 }
 0x29f   :  { %v1774_v15 = vpop.permute.xlu0 %1773  ;;  %2447 = vmatpush3.bf16.msra.mxu1 %v2812_v54  ;;  %2388 = vmatprep.mubr.msk.f32.mxu1 %vm2521_vm0, %v3583_v34 }
 0x2a0   :  { %v1893_v30 = vpop.permute.xlu1 %1892  ;;  %2398 = vmatprep.subr.mxu1 %v3583_v34  ;;  %p2497_p12 = pnand %p2496_p11, %p2490_p8 }
 0x2a1   :  { %v1903_v8 = vadd.f32 %v1893_v30, %v1883_v45 }
 0x2a3   :  { %v1054_v35 = vld [vmem:[#allocation2] sm:$0xf]  ;;  %v1895_v14 = vpop.permute.xlu0 %1894  ;;  %v1910_v62 = vrot.slane %v1903_v8, 7 }
 0x2a4   :  { %1254 = vst.msk [vmem:[#allocation2] sm:$0xf] %vm184_vm5, %v1250_v56  ;;  %2338 = vmatpush3.msk.msra.mxu0 %vm1059_vm13, %v1054_v35  ;;  %v2016_v26 = vpop.permute.xlu1 %2015  ;;  %v1904_v17 = vadd.f32 %v1895_v14, %v1884_v47  ;;  %v1780_v56 = vadd.f32 %v1770_v40, %v3653_v53  ;;  %v1782_v47 = vadd.f32 %v1774_v15, %v1762_v9 }
 0x2a5   :  { %2340 = vmatmul.mubr.msk.f32.vlgmr.msra.gmra.mrb[8].mxu0 %vm1055_vm14, %v3361_v32  ;;  %2430 = vmatprep.subr.bf16.mxu0 %v3586_v52  ;;  %v2026_v57 = vadd.f32 %v2016_v26, %v2006_v50 }
 0x2a6   :  { %2432 = vmatpush3.bf16.msra.mxu0 %v2812_v54  ;;  %2353 = vmatprep.mubr.msk.f32.mxu0 %vm2521_vm0, %v3583_v34  ;;  %v1912_v49 = vrot.slane %v1904_v17, 6  ;;  %v1787_v58 = vrot.slane %v1780_v56, 7  ;;  %v1791_v7 = vrot.slane %v1782_v47, 5 }
 0x2a7   :  { %v1891_v45 = vpop.permute.xlu0 %1890  ;;  %2436 = vmatprep.subr.bf16.mxu0 %v3586_v52  ;;  %v2033_v44 = vrot.slane %v2026_v57, 7 }
 0x2a8   :  { %v1902_v21 = vadd.f32 %v1891_v45, %v1882_v20  ;;  %v1897_v40 = vpop.permute.xlu1 %1896  ;;  %v1546_v20 = vsel %vm109_vm3, %v1545_v5, %v1544_v51 }
 0x2a9   :  { %v1905_v48 = vadd.f32 %v1897_v40, %v1885_v38  ;;  %2354 = vmatmul.mubr.msk.f32.vlgmr.msra.gmra.mrb[10].mxu0 %vm111_vm4, %v3233_v43  ;;  %v1788_v43 = vsel %vm103_vm2, %v1787_v58, %v1779_v1 }
 0x2aa   :  { %v1911_v9 = vsel %vm103_vm2, %v1910_v62, %v1902_v21  ;;  %2438 = vmatpush3.bf16.msra.mxu0 %v2812_v54  ;;  %2367 = vmatprep.mubr.msk.f32.mxu0 %vm2521_vm0, %v3583_v34  ;;  %v1790_v59 = vsel %vm106_vm1, %v1789_v13, %v1788_v43 }
 0x2ab   :  { %v1913_v18 = vsel %vm106_vm1, %v1912_v49, %v1911_v9  ;;  %v1914_v42 = vrot.slane %v1905_v48, 5  ;;  %v2018_v2 = vpop.permute.xlu0 %2017  ;;  %2442 = vmatprep.subr.bf16.mxu0 %v3586_v52  ;;  %v1792_v0 = vsel %vm109_vm3, %v1791_v7, %v1790_v59 }
 0x2ac   :  { %v2027_v60 = vadd.f32 %v2018_v2, %v2007_v55  ;;  %v2014_v50 = vpop.permute.xlu1 %2013 }
 0x2ad   :  { %v1915_v38 = vsel %vm109_vm3, %v1914_v42, %v1913_v18  ;;  %v2025_v33 = vadd.f32 %v2014_v50, %v2005_v10  ;;  %2368 = vmatmul.mubr.msk.f32.vlgmr.msra.gmra.mrb[12].mxu0 %vm111_vm4, %v1546_v20 }
 0x2ae   :  { %2444 = vmatpush3.bf16.msra.mxu0 %v2812_v54  ;;  %2389 = vmatmul.mubr.msk.f32.vlgmr.msra.gmra.mrb[14].mxu1 %vm111_vm4, %v1915_v38  ;;  %v2035_v23 = vrot.slane %v2027_v60, 6 }
 0x2af   :  { %v2020_v55 = vpop.permute.xlu0 %2019  ;;  %2381 = vmatprep.mubr.msk.f32.mxu0 %vm2521_vm0, %v3583_v34  ;;  %2448 = vmatprep.subr.bf16.mxu0 %v3586_v52  ;;  %v2034_v46 = vsel %vm103_vm2, %v2033_v44, %v2025_v33 }
 0x2b0   :  { %v2028_v10 = vadd.f32 %v2020_v55, %v2008_v27  ;;  %2400 = vmatprep.mubr.msk.f32.mxu1 %vm2521_vm0, %v3583_v34  ;;  %v2036_v52 = vsel %vm106_vm1, %v2035_v23, %v2034_v46 }
 0x2b1   :  { %2382 = vmatmul.mubr.msk.f32.vlgmr.msra.gmra.mrb[14].mxu0 %vm111_vm4, %v1792_v0 }
 0x2b2   :  { %v2037_v37 = vrot.slane %v2028_v10, 5  ;;  %2450 = vmatpush3.bf16.msra.mxu0 %v2812_v54  ;;  %2395 = vmatprep.mubr.msk.f32.mxu0 %vm2521_vm0, %v3583_v34 }
 0x2b4   :  { %v2038_v4 = vsel %vm109_vm3, %v2037_v37, %v2036_v52 }
 0x2b5   :  { %2396 = vmatmul.mubr.msk.f32.vlgmr.msra.gmra.mrb[16].mxu0 %vm111_vm4, %v2038_v4 }
 0x2bb   :  { %v1498_v31 = vpop.permute.xlu0 %1497 }
 0x371   :  { %v1738_v39 = vpop.f32.mrb[12].mxu1 }
 0x372   :  { %1743 = vrot.lane.b32.xlu0 %v1738_v39, %s2525_s14  ;;  %v2376_v3 = vpop.f32.mrb[13].mxu1 }
 0x378   :  { %v1129_v27 = vpop.f32.mrb[8].mxu0 }
 0x379   :  { %1134 = vst.msk [vmem:[#allocation6] sm:$0xff] %vm1133_vm15, %v1129_v27  ;;  %v2341_v63 = vpop.f32.mrb[9].mxu0 }
 0x37c   :  { %v1369_v28 = vpop.f32.mrb[10].mxu0 }
 0x37d   :  { %1374 = vrot.lane.b32.xlu1 %v1369_v28, %s2517_s29  ;;  %v2355_v54 = vpop.f32.mrb[11].mxu0 }
 0x380   :  { %v1615_v34 = vpop.f32.mrb[12].mxu0 }
 0x381   :  { %1620 = vrot.lane.b32.xlu1 %v1615_v34, %s2524_s13  ;;  %v2369_v22 = vpop.f32.mrb[13].mxu0  ;;  %v1984_v36 = vpop.f32.mrb[14].mxu1 }
 0x382   :  { %1989 = vrot.lane.b32.xlu0 %v1984_v36, %s2527_s16  ;;  %v2390_v25 = vpop.f32.mrb[15].mxu1 }
 0x384   :  { %v1861_v61 = vpop.f32.mrb[14].mxu0 }
 0x385   :  { %1866 = vrot.lane.b32.xlu1 %v1861_v61, %s2526_s15  ;;  %v2383_v15 = vpop.f32.mrb[15].mxu0 }
 0x388   :  { %v2107_v30 = vpop.f32.mrb[16].mxu0 }
 0x389   :  { %2112 = vrot.lane.b32.xlu1 %v2107_v30, %s2528_s17  ;;  %v2397_v11 = vpop.f32.mrb[17].mxu0 }
 0x3e4   :  { %v1744_v14 = vpop.permute.xlu0 %1743 }
 0x3ef   :  { %v1375_v12 = vpop.permute.xlu1 %1374 }
 0x3f0   :  { %1377 = vst.msk [vmem:[#allocation2] sm:$0xf] %vm308_vm6, %v1375_v12 }
 0x3f1   :  { %1500 = vst.msk [vmem:[#allocation2] sm:$0xf] %vm432_vm7, %v1498_v31 }
 0x3f3   :  { %v1621_v35 = vpop.permute.xlu1 %1620 }
 0x3f4   :  { %1623 = vst.msk [vmem:[#allocation2] sm:$0xf] %vm556_vm8, %v1621_v35  ;;  %v1990_v26 = vpop.permute.xlu0 %1989 }
 0x3f5   :  { %1746 = vst.msk [vmem:[#allocation2] sm:$0xf] %vm680_vm9, %v1744_v14 }
 0x3f7   :  { %v1867_v8 = vpop.permute.xlu1 %1866 }
 0x3f8   :  { %1869 = vst.msk [vmem:[#allocation2] sm:$0xf] %vm804_vm10, %v1867_v8 }
 0x3f9   :  { %1992 = vst.msk [vmem:[#allocation2] sm:$0xf] %vm928_vm11, %v1990_v26 }
 0x3fb   :  { %v2113_v17 = vpop.permute.xlu1 %2112 }
 0x3fc   :  { %2115 = vst.msk [vmem:[#allocation2] sm:$0xf] %vm1052_vm12, %v2113_v17 }
 0x403   :  { %v2116_v41 = vld [vmem:[#allocation2] sm:$0xf] }
 0x404   :  { %2399 = vmatpush3.msk.msra.mxu1 %vm1059_vm13, %v2116_v41 }
 0x405   :  { %2401 = vmatmul.mubr.msk.f32.vlgmr.msra.gmra.mrb[16].mxu1 %vm1055_vm14, %v3361_v32 }
 0x4d8   :  { %v2186_v19 = vpop.f32.mrb[16].mxu1 }
 0x4d9   :  { %2191 = vst.msk [vmem:[#allocation6 + $0x8] sm:$0xff] %vm1133_vm15, %v2186_v19  ;;  %v2402_v29 = vpop.f32.mrb[17].mxu1 }
 0x4da   :  { %2500 = shalt.err (!%p2497_p12)
}
 0x4db   :  { %s2501_s24 = scalar_lea.hbm %s3469_s5, 256 }
 0x4dc   :  { %p2502_p13 = scmp.ne.s32.totalorder %s3469_s5, %s2501_s24  ;;  %p2505_p0 = scmp.lt.u32.totalorder %s2501_s24, %s3469_s5 }
 0x4de   :  { %p2507_p1 = pnand %p2505_p0, %p2502_p13 }
 0x4e0   :  { %2510 = shalt.err (!%p2507_p1)
}
 0x4e1   :  { %2203 = dma.vmem_to_hbm [thread:$0]  %s2198_s20, 256, %s3469_s5, [#allocation5], %s2516_s28, %s2516_s28, %s2517_s29  }
 0x4e2   :  { %2513 = dma.done.wait [#allocation5], 256  }
 0x4e3   :  { %2514 = vsyncadd [#allocation5], 4294967040 }
 0x4e4   :  { %2207 = vsyncpa [#allocation4], 1 }
 0x4e5   :  { %2208 = vsyncpa [#allocation5], 1 }

</bundles_post_ra>
